<compile_context>
chip_gen: v7x
topology: tpu7x:2x2x1
jax: 0.10.0
libtpu: 0.0.40
codegen_flags: <defaults>
</compile_context>

<pallas_src>
import math

import jax
import jax.numpy as jnp
from jax.experimental import pallas as pl
from jax.experimental.pallas import tpu as pltpu

_INV_SQRT2 = 1.0 / math.sqrt(2.0)


# ----------------------------- Pallas kernel ------------------------------- #

def _moe_kernel(flags_ref,                       # SMEM (num_tiles, E) int32
                x_ref, g_ref,                    # (tm, D) bf16, (tm, E) f32
                w1_ref, b1_ref, w2_ref, b2_ref,  # resident expert weights
                out_ref,                         # (tm, O)
                acc_ref):                        # VMEM (tm, O) f32 scratch
    i = pl.program_id(0)
    acc_ref[...] = jnp.zeros_like(acc_ref)

    x = x_ref[...]                               # (tm, D) bf16 MXU operand
    g = g_ref[...]                               # (tm, E) f32 gates

    num_experts = w1_ref.shape[0]
    for e in range(num_experts):                 # static unroll, E is small
        # Skip experts that no token in this tile routes to (zero gates).
        @pl.when(flags_ref[i, e] != 0)
        def _(e=e):
            h = jnp.dot(x, w1_ref[e], preferred_element_type=jnp.float32)
            h = h + b1_ref[e]                    # f32 bias
            # exact erf GELU (torch.nn.GELU() default), kept in f32
            h = 0.5 * h * (1.0 + jax.lax.erf(h * _INV_SQRT2))
            o = jnp.dot(h.astype(w2_ref.dtype), w2_ref[e],
                        preferred_element_type=jnp.float32)
            o = o + b2_ref[e]
            acc_ref[...] += g[:, e:e + 1] * o    # gate-weighted scatter-add

    out_ref[...] = acc_ref[...].astype(out_ref.dtype)


# ----------------------------- pallas_call wrapper -------------------------- #

def moe_ffn(flags, x, gates, w1, b1, w2, b2, *, tm, out_dtype):
    T, D = x.shape
    E, _, H = w1.shape
    O = w2.shape[-1]
    num_tiles = T // tm
    return pl.pallas_call(
        _moe_kernel,
        out_shape=jax.ShapeDtypeStruct((T, O), out_dtype),
        grid_spec=pltpu.PrefetchScalarGridSpec(
            num_scalar_prefetch=1,               # flags -> SMEM
            grid=(num_tiles,),
            in_specs=[
                # streaming per token tile
                pl.BlockSpec((tm, D), lambda i, flags: (i, 0)),      # x (bf16)
                pl.BlockSpec((tm, E), lambda i, flags: (i, 0)),      # gates (f32)
                # expert weights: constant block index -> DMA'd once, resident
                pl.BlockSpec((E, D, H), lambda i, flags: (0, 0, 0)),  # W1
                pl.BlockSpec((E, 1, H), lambda i, flags: (0, 0, 0)),  # b1
                pl.BlockSpec((E, H, O), lambda i, flags: (0, 0, 0)),  # W2
                pl.BlockSpec((E, 1, O), lambda i, flags: (0, 0, 0)),  # b2
            ],
            out_specs=pl.BlockSpec((tm, O), lambda i, flags: (i, 0)),
            scratch_shapes=[pltpu.VMEM((tm, O), jnp.float32)],
        ),
        compiler_params=pltpu.CompilerParams(
            dimension_semantics=("parallel",),   # token tiles shard across TCs (v7x)
            vmem_limit_bytes=32 * 1024 * 1024,   # explicit budget, safe on v7x
        ),
    )(flags, x, gates, w1, b1.reshape(E, 1, H), w2, b2.reshape(E, 1, O))


# ----------------------------- JAX glue (routing / losses) ------------------ #

def compute_gates_and_aux(probs, *, top_k, capacity_factor, batch_size,
                          num_experts, world_size=1):
    expert_weights, expert_indices = jax.lax.top_k(probs, top_k)          # (T, k)
    capacity = int(capacity_factor * batch_size / (top_k * world_size))
    capacity = max(capacity, 1)

    onehot = expert_indices[..., None] == jnp.arange(num_experts)[None, None, :]
    expert_mask = onehot.sum(axis=1)                                      # (T, E)
    routed = expert_mask > 0
    expert_count = expert_mask.sum(axis=0)        # all_reduce is identity (ws=1)

    # per-token weight for each expert (0 if not in its top-k)
    w_per_expert = jnp.sum(jnp.where(onehot, expert_weights[..., None], 0.0), axis=1)

    # keep only the first `capacity` tokens (in token order) routed to each expert
    excl_rank = jnp.cumsum(routed.astype(jnp.int32), axis=0) - routed.astype(jnp.int32)
    keep = routed & (excl_rank < capacity)
    gates = jnp.where(keep, w_per_expert, 0.0)                            # (T, E)

    density = probs.mean(axis=0)
    usage = expert_count.astype(jnp.float32) / (batch_size * world_size)
    balance_loss = jnp.sum(density * usage) * num_experts
    important = probs.sum(axis=0)                 # all_reduce is identity (ws=1)
    important_loss = jnp.mean(important ** 2)
    aux_loss = balance_loss + important_loss
    return gates, aux_loss


def moe_ep_forward(x, params, *, top_k, capacity_factor, tm=128):
    orig_shape = x.shape
    batch_size = orig_shape[0]                   # x.size(0) before the view
    x2 = x.reshape(-1, orig_shape[-1])
    T, D = x2.shape
    E = params["w1"].shape[0]

    # Router in plain XLA (tiny op; E=4 output would be lane-sparse in Pallas).
    logits = x2 @ params["wr"] + params["br"]
    probs = jax.nn.softmax(logits, axis=-1)

    gates, aux_loss = compute_gates_and_aux(
        probs, top_k=top_k, capacity_factor=capacity_factor,
        batch_size=batch_size, num_experts=E)

    # Pad the token axis to a multiple of tm (padded rows have zero gates ->
    # contribute nothing; sliced away afterwards).
    T_pad = ((T + tm - 1) // tm) * tm
    pad = T_pad - T
    x_pad = jnp.pad(x2, ((0, pad), (0, 0)))
    gates_pad = jnp.pad(gates, ((0, pad), (0, 0))).astype(jnp.float32)
    num_tiles = T_pad // tm

    # per-(tile, expert) "any token routed" flags for dead-expert skipping
    flags = (gates_pad.reshape(num_tiles, tm, E) != 0).any(axis=1).astype(jnp.int32)

    y_pad = moe_ffn(
        flags,
        x_pad.astype(jnp.bfloat16),              # bf16 MXU operands
        gates_pad,
        params["w1"].astype(jnp.bfloat16),
        params["b1"].astype(jnp.float32),
        params["w2"].astype(jnp.bfloat16),
        params["b2"].astype(jnp.float32),
        tm=tm, out_dtype=x2.dtype)
    y = y_pad[:T]
    return y.reshape(orig_shape), aux_loss


# ----------------------------- params / reference --------------------------- #

def init_params(key, D, H, O, E):
    ks = jax.random.split(key, 6)

    def lin(k, fan_in, shape):                   # torch.nn.Linear-style uniform init
        bound = 1.0 / math.sqrt(fan_in)
        return jax.random.uniform(k, shape, jnp.float32, -bound, bound)

    return dict(
        wr=lin(ks[0], D, (D, E)), br=lin(ks[1], D, (E,)),
        w1=lin(ks[2], D, (E, D, H)), b1=lin(ks[3], D, (E, H)),
        w2=lin(ks[4], H, (E, H, O)), b2=lin(ks[5], H, (E, O)),
    )


def reference_forward(x, params, *, top_k, capacity_factor, match_bf16=True):
    """Pure-JAX reference.  match_bf16=True mirrors the kernel's bf16 MXU
    operands (f32 accumulation) for a tight correctness check."""
    orig_shape = x.shape
    x2 = x.reshape(-1, orig_shape[-1])
    logits = x2 @ params["wr"] + params["br"]
    probs = jax.nn.softmax(logits, axis=-1)
    E = params["w1"].shape[0]
    gates, aux = compute_gates_and_aux(
        probs, top_k=top_k, capacity_factor=capacity_factor,
        batch_size=orig_shape[0], num_experts=E)

    xm = x2.astype(jnp.bfloat16) if match_bf16 else x2
    y = jnp.zeros_like(x2)
    for ei in range(E):
        w1 = params["w1"][ei].astype(jnp.bfloat16) if match_bf16 else params["w1"][ei]
        w2 = params["w2"][ei].astype(jnp.bfloat16) if match_bf16 else params["w2"][ei]
        h = jnp.dot(xm, w1, preferred_element_type=jnp.float32) + params["b1"][ei]
        h = 0.5 * h * (1.0 + jax.lax.erf(h * _INV_SQRT2))
        hm = h.astype(jnp.bfloat16) if match_bf16 else h
        o = jnp.dot(hm, w2, preferred_element_type=jnp.float32) + params["b2"][ei]
        y = y + gates[:, ei:ei + 1] * o
    return y.reshape(orig_shape), aux


# ----------------------------- main ----------------------------------------- #

if __name__ == "__main__":
    input_dim, hidden_dim, output_dim = 32, 64, 32    # output_dim == input_dim (scatter
    num_experts, top_k, capacity_factor = 4, 2, 1.25  # adds into zeros_like(x))
    tokens = 16                                       # x is (batch, input_dim)

    key = jax.random.PRNGKey(0)
    kx, kp = jax.random.split(key)
    x = jax.random.normal(kx, (tokens, input_dim), jnp.float32)
    params = init_params(kp, input_dim, hidden_dim, output_dim, num_experts)

    y, aux = moe_ep_forward(x, params, top_k=top_k, capacity_factor=capacity_factor)
    (y, aux) = jax.block_until_ready((y, aux))

    # Tight check against a reference using the same bf16 MXU operands.
    y_ref, aux_ref = reference_forward(x, params, top_k=top_k,
                                       capacity_factor=capacity_factor,
                                       match_bf16=True)
    assert jnp.allclose(y, y_ref, atol=2e-3, rtol=2e-3), float(jnp.max(jnp.abs(y - y_ref)))
    assert jnp.allclose(aux, aux_ref, atol=1e-4, rtol=1e-4)

    # Loose sanity check against the full-f32 reference (bf16 rounding only).
    y_f32, _ = reference_forward(x, params, top_k=top_k,
                                 capacity_factor=capacity_factor,
                                 match_bf16=False)
    assert jnp.allclose(y, y_f32, atol=1e-1, rtol=1e-1), float(jnp.max(jnp.abs(y - y_f32)))

    print("KERNEL_OK")
</pallas_src>

<mosaic_0001>
module attributes {stable_mosaic.version = 11 : i64} {
  func.func @_moe_kernel(%arg0: i32, %arg1: memref<1x4xi32, #tpu.memory_space<smem>>, %arg2: memref<128x32xbf16, #tpu.memory_space<vmem>>, %arg3: memref<128x4xf32, #tpu.memory_space<vmem>>, %arg4: memref<4x32x64xbf16, #tpu.memory_space<vmem>>, %arg5: memref<4x1x64xf32, #tpu.memory_space<vmem>>, %arg6: memref<4x64x32xbf16, #tpu.memory_space<vmem>>, %arg7: memref<4x1x32xf32, #tpu.memory_space<vmem>>, %arg8: memref<128x32xf32, #tpu.memory_space<vmem>>, %arg9: memref<128x32xf32, #tpu.memory_space<vmem>>) attributes {dimension_semantics = [#tpu.dimension_semantics<parallel>], iteration_bounds = array<i64: 1>, scalar_prefetch = 1 : i64, scratch_operands = 1 : i64, tpu.core_type = #tpu.core_type<tc>, window_params = [{transform_indices = @transform_0, window_bounds = array<i64: 128, 32>}, {transform_indices = @transform_1, window_bounds = array<i64: 128, 4>}, {pipeline_mode = #tpu.pipeline_mode<synchronous>, transform_indices = @transform_2, window_bounds = array<i64: 4, 32, 64>}, {pipeline_mode = #tpu.pipeline_mode<synchronous>, transform_indices = @transform_3, window_bounds = array<i64: 4, 1, 64>}, {pipeline_mode = #tpu.pipeline_mode<synchronous>, transform_indices = @transform_4, window_bounds = array<i64: 4, 64, 32>}, {pipeline_mode = #tpu.pipeline_mode<synchronous>, transform_indices = @transform_5, window_bounds = array<i64: 4, 1, 32>}, {transform_indices = @transform_6, window_bounds = array<i64: 128, 32>}]} {
    %cst = arith.constant 0.000000e+00 : f32
    %0 = vector.broadcast %cst : f32 to vector<128x32xf32>
    %c0 = arith.constant 0 : index
    %c0_0 = arith.constant 0 : index
    %1 = vector.load %arg9[%c0, %c0_0] : memref<128x32xf32, #tpu.memory_space<vmem>>, vector<128x32xf32>
    tpu.vector_store %arg9[%c0, %c0_0], %0 {strides = array<i32>} : memref<128x32xf32, #tpu.memory_space<vmem>>, vector<128x32xf32>,
    %c0_1 = arith.constant 0 : index
    %c0_2 = arith.constant 0 : index
    %2 = vector.load %arg2[%c0_1, %c0_2] : memref<128x32xbf16, #tpu.memory_space<vmem>>, vector<128x32xbf16>
    %c0_3 = arith.constant 0 : index
    %c0_4 = arith.constant 0 : index
    %3 = vector.load %arg3[%c0_3, %c0_4] : memref<128x4xf32, #tpu.memory_space<vmem>>, vector<128x4xf32>
    %4 = arith.index_cast %arg0 : i32 to index
    %c0_5 = arith.constant 0 : index
    %5 = memref.load %arg1[%4, %c0_5] : memref<1x4xi32, #tpu.memory_space<smem>>
    %c0_i32 = arith.constant 0 : i32
    %6 = arith.cmpi ne, %5, %c0_i32 : i32
    %7 = arith.extui %6 : i1 to i32
    %c0_i32_6 = arith.constant 0 : i32
    %8 = arith.cmpi ne, %7, %c0_i32_6 : i32
    scf.if %8 {
      %c0_17 = arith.constant 0 : index
      %c0_18 = arith.constant 0 : index
      %c0_19 = arith.constant 0 : index
      %26 = vector.load %arg4[%c0_17, %c0_18, %c0_19] : memref<4x32x64xbf16, #tpu.memory_space<vmem>>, vector<1x32x64xbf16>
      %27 = vector.shape_cast %26 : vector<1x32x64xbf16> to vector<32x64xbf16>
      %cst_20 = arith.constant dense<0.000000e+00> : vector<128x64xf32>
      %28 = tpu.matmul %2, %27, %cst_20 {dimension_numbers = #tpu.dot_dimension_numbers<[1], [0], [0], [1], [0, 0, 1, 1], [], []>} : vector<128x32xbf16>, vector<32x64xbf16>, vector<128x64xf32> -> vector<128x64xf32>
      %c0_21 = arith.constant 0 : index
      %c0_22 = arith.constant 0 : index
      %c0_23 = arith.constant 0 : index
      %29 = vector.load %arg5[%c0_21, %c0_22, %c0_23] : memref<4x1x64xf32, #tpu.memory_space<vmem>>, vector<1x1x64xf32>
      %30 = vector.shape_cast %29 : vector<1x1x64xf32> to vector<1x64xf32>
      %31 = vector.broadcast %30 : vector<1x64xf32> to vector<128x64xf32>
      %32 = arith.addf %28, %31 : vector<128x64xf32>
      %cst_24 = arith.constant 5.000000e-01 : f32
      %33 = vector.broadcast %cst_24 : f32 to vector<128x64xf32>
      %34 = arith.mulf %33, %32 : vector<128x64xf32>
      %cst_25 = arith.constant 0.707106769 : f32
      %35 = vector.broadcast %cst_25 : f32 to vector<128x64xf32>
      %36 = arith.mulf %32, %35 : vector<128x64xf32>
      %37 = math.erf %36 : vector<128x64xf32>
      %cst_26 = arith.constant 1.000000e+00 : f32
      %38 = vector.broadcast %cst_26 : f32 to vector<128x64xf32>
      %39 = arith.addf %38, %37 : vector<128x64xf32>
      %40 = arith.mulf %34, %39 : vector<128x64xf32>
      %41 = arith.truncf %40 : vector<128x64xf32> to vector<128x64xbf16>
      %c0_27 = arith.constant 0 : index
      %c0_28 = arith.constant 0 : index
      %c0_29 = arith.constant 0 : index
      %42 = vector.load %arg6[%c0_27, %c0_28, %c0_29] : memref<4x64x32xbf16, #tpu.memory_space<vmem>>, vector<1x64x32xbf16>
      %43 = vector.shape_cast %42 : vector<1x64x32xbf16> to vector<64x32xbf16>
      %cst_30 = arith.constant dense<0.000000e+00> : vector<128x32xf32>
      %44 = tpu.matmul %41, %43, %cst_30 {dimension_numbers = #tpu.dot_dimension_numbers<[1], [0], [0], [1], [0, 0, 1, 1], [], []>} : vector<128x64xbf16>, vector<64x32xbf16>, vector<128x32xf32> -> vector<128x32xf32>
      %c0_31 = arith.constant 0 : index
      %c0_32 = arith.constant 0 : index
      %c0_33 = arith.constant 0 : index
      %45 = vector.load %arg7[%c0_31, %c0_32, %c0_33] : memref<4x1x32xf32, #tpu.memory_space<vmem>>, vector<1x1x32xf32>
      %46 = vector.shape_cast %45 : vector<1x1x32xf32> to vector<1x32xf32>
      %47 = vector.broadcast %46 : vector<1x32xf32> to vector<128x32xf32>
      %48 = arith.addf %44, %47 : vector<128x32xf32>
      %c0_34 = arith.constant 0 : index
      %c0_35 = arith.constant 0 : index
      %49 = vector.load %arg9[%c0_34, %c0_35] : memref<128x32xf32, #tpu.memory_space<vmem>>, vector<128x32xf32>
      %50 = vector.extract_strided_slice %3 {offsets = [0, 0], sizes = [128, 1], strides = [1, 1]} : vector<128x4xf32> to vector<128x1xf32>
      %51 = vector.broadcast %50 : vector<128x1xf32> to vector<128x32xf32>
      %52 = arith.mulf %51, %48 : vector<128x32xf32>
      %53 = arith.addf %49, %52 : vector<128x32xf32>
      %c0_36 = arith.constant 0 : index
      %c0_37 = arith.constant 0 : index
      %54 = vector.load %arg9[%c0_36, %c0_37] : memref<128x32xf32, #tpu.memory_space<vmem>>, vector<128x32xf32>
      tpu.vector_store %arg9[%c0_36, %c0_37], %53 {strides = array<i32>} : memref<128x32xf32, #tpu.memory_space<vmem>>, vector<128x32xf32>,
    } else {
    }
    %9 = arith.index_cast %arg0 : i32 to index
    %c1 = arith.constant 1 : index
    %10 = memref.load %arg1[%9, %c1] : memref<1x4xi32, #tpu.memory_space<smem>>
    %c0_i32_7 = arith.constant 0 : i32
    %11 = arith.cmpi ne, %10, %c0_i32_7 : i32
    %12 = arith.extui %11 : i1 to i32
    %c0_i32_8 = arith.constant 0 : i32
    %13 = arith.cmpi ne, %12, %c0_i32_8 : i32
    scf.if %13 {
      %c1_17 = arith.constant 1 : index
      %c0_18 = arith.constant 0 : index
      %c0_19 = arith.constant 0 : index
      %26 = vector.load %arg4[%c1_17, %c0_18, %c0_19] : memref<4x32x64xbf16, #tpu.memory_space<vmem>>, vector<1x32x64xbf16>
      %27 = vector.shape_cast %26 : vector<1x32x64xbf16> to vector<32x64xbf16>
      %cst_20 = arith.constant dense<0.000000e+00> : vector<128x64xf32>
      %28 = tpu.matmul %2, %27, %cst_20 {dimension_numbers = #tpu.dot_dimension_numbers<[1], [0], [0], [1], [0, 0, 1, 1], [], []>} : vector<128x32xbf16>, vector<32x64xbf16>, vector<128x64xf32> -> vector<128x64xf32>
      %c1_21 = arith.constant 1 : index
      %c0_22 = arith.constant 0 : index
      %c0_23 = arith.constant 0 : index
      %29 = vector.load %arg5[%c1_21, %c0_22, %c0_23] : memref<4x1x64xf32, #tpu.memory_space<vmem>>, vector<1x1x64xf32>
      %30 = vector.shape_cast %29 : vector<1x1x64xf32> to vector<1x64xf32>
      %31 = vector.broadcast %30 : vector<1x64xf32> to vector<128x64xf32>
      %32 = arith.addf %28, %31 : vector<128x64xf32>
      %cst_24 = arith.constant 5.000000e-01 : f32
      %33 = vector.broadcast %cst_24 : f32 to vector<128x64xf32>
      %34 = arith.mulf %33, %32 : vector<128x64xf32>
      %cst_25 = arith.constant 0.707106769 : f32
      %35 = vector.broadcast %cst_25 : f32 to vector<128x64xf32>
      %36 = arith.mulf %32, %35 : vector<128x64xf32>
      %37 = math.erf %36 : vector<128x64xf32>
      %cst_26 = arith.constant 1.000000e+00 : f32
      %38 = vector.broadcast %cst_26 : f32 to vector<128x64xf32>
      %39 = arith.addf %38, %37 : vector<128x64xf32>
      %40 = arith.mulf %34, %39 : vector<128x64xf32>
      %41 = arith.truncf %40 : vector<128x64xf32> to vector<128x64xbf16>
      %c1_27 = arith.constant 1 : index
      %c0_28 = arith.constant 0 : index
      %c0_29 = arith.constant 0 : index
      %42 = vector.load %arg6[%c1_27, %c0_28, %c0_29] : memref<4x64x32xbf16, #tpu.memory_space<vmem>>, vector<1x64x32xbf16>
      %43 = vector.shape_cast %42 : vector<1x64x32xbf16> to vector<64x32xbf16>
      %cst_30 = arith.constant dense<0.000000e+00> : vector<128x32xf32>
      %44 = tpu.matmul %41, %43, %cst_30 {dimension_numbers = #tpu.dot_dimension_numbers<[1], [0], [0], [1], [0, 0, 1, 1], [], []>} : vector<128x64xbf16>, vector<64x32xbf16>, vector<128x32xf32> -> vector<128x32xf32>
      %c1_31 = arith.constant 1 : index
      %c0_32 = arith.constant 0 : index
      %c0_33 = arith.constant 0 : index
      %45 = vector.load %arg7[%c1_31, %c0_32, %c0_33] : memref<4x1x32xf32, #tpu.memory_space<vmem>>, vector<1x1x32xf32>
      %46 = vector.shape_cast %45 : vector<1x1x32xf32> to vector<1x32xf32>
      %47 = vector.broadcast %46 : vector<1x32xf32> to vector<128x32xf32>
      %48 = arith.addf %44, %47 : vector<128x32xf32>
      %c0_34 = arith.constant 0 : index
      %c0_35 = arith.constant 0 : index
      %49 = vector.load %arg9[%c0_34, %c0_35] : memref<128x32xf32, #tpu.memory_space<vmem>>, vector<128x32xf32>
      %50 = vector.extract_strided_slice %3 {offsets = [0, 1], sizes = [128, 1], strides = [1, 1]} : vector<128x4xf32> to vector<128x1xf32>
      %51 = vector.broadcast %50 : vector<128x1xf32> to vector<128x32xf32>
      %52 = arith.mulf %51, %48 : vector<128x32xf32>
      %53 = arith.addf %49, %52 : vector<128x32xf32>
      %c0_36 = arith.constant 0 : index
      %c0_37 = arith.constant 0 : index
      %54 = vector.load %arg9[%c0_36, %c0_37] : memref<128x32xf32, #tpu.memory_space<vmem>>, vector<128x32xf32>
      tpu.vector_store %arg9[%c0_36, %c0_37], %53 {strides = array<i32>} : memref<128x32xf32, #tpu.memory_space<vmem>>, vector<128x32xf32>,
    } else {
    }
    %14 = arith.index_cast %arg0 : i32 to index
    %c2 = arith.constant 2 : index
    %15 = memref.load %arg1[%14, %c2] : memref<1x4xi32, #tpu.memory_space<smem>>
    %c0_i32_9 = arith.constant 0 : i32
    %16 = arith.cmpi ne, %15, %c0_i32_9 : i32
    %17 = arith.extui %16 : i1 to i32
    %c0_i32_10 = arith.constant 0 : i32
    %18 = arith.cmpi ne, %17, %c0_i32_10 : i32
    scf.if %18 {
      %c2_17 = arith.constant 2 : index
      %c0_18 = arith.constant 0 : index
      %c0_19 = arith.constant 0 : index
      %26 = vector.load %arg4[%c2_17, %c0_18, %c0_19] : memref<4x32x64xbf16, #tpu.memory_space<vmem>>, vector<1x32x64xbf16>
      %27 = vector.shape_cast %26 : vector<1x32x64xbf16> to vector<32x64xbf16>
      %cst_20 = arith.constant dense<0.000000e+00> : vector<128x64xf32>
      %28 = tpu.matmul %2, %27, %cst_20 {dimension_numbers = #tpu.dot_dimension_numbers<[1], [0], [0], [1], [0, 0, 1, 1], [], []>} : vector<128x32xbf16>, vector<32x64xbf16>, vector<128x64xf32> -> vector<128x64xf32>
      %c2_21 = arith.constant 2 : index
      %c0_22 = arith.constant 0 : index
      %c0_23 = arith.constant 0 : index
      %29 = vector.load %arg5[%c2_21, %c0_22, %c0_23] : memref<4x1x64xf32, #tpu.memory_space<vmem>>, vector<1x1x64xf32>
      %30 = vector.shape_cast %29 : vector<1x1x64xf32> to vector<1x64xf32>
      %31 = vector.broadcast %30 : vector<1x64xf32> to vector<128x64xf32>
      %32 = arith.addf %28, %31 : vector<128x64xf32>
      %cst_24 = arith.constant 5.000000e-01 : f32
      %33 = vector.broadcast %cst_24 : f32 to vector<128x64xf32>
      %34 = arith.mulf %33, %32 : vector<128x64xf32>
      %cst_25 = arith.constant 0.707106769 : f32
      %35 = vector.broadcast %cst_25 : f32 to vector<128x64xf32>
      %36 = arith.mulf %32, %35 : vector<128x64xf32>
      %37 = math.erf %36 : vector<128x64xf32>
      %cst_26 = arith.constant 1.000000e+00 : f32
      %38 = vector.broadcast %cst_26 : f32 to vector<128x64xf32>
      %39 = arith.addf %38, %37 : vector<128x64xf32>
      %40 = arith.mulf %34, %39 : vector<128x64xf32>
      %41 = arith.truncf %40 : vector<128x64xf32> to vector<128x64xbf16>
      %c2_27 = arith.constant 2 : index
      %c0_28 = arith.constant 0 : index
      %c0_29 = arith.constant 0 : index
      %42 = vector.load %arg6[%c2_27, %c0_28, %c0_29] : memref<4x64x32xbf16, #tpu.memory_space<vmem>>, vector<1x64x32xbf16>
      %43 = vector.shape_cast %42 : vector<1x64x32xbf16> to vector<64x32xbf16>
      %cst_30 = arith.constant dense<0.000000e+00> : vector<128x32xf32>
      %44 = tpu.matmul %41, %43, %cst_30 {dimension_numbers = #tpu.dot_dimension_numbers<[1], [0], [0], [1], [0, 0, 1, 1], [], []>} : vector<128x64xbf16>, vector<64x32xbf16>, vector<128x32xf32> -> vector<128x32xf32>
      %c2_31 = arith.constant 2 : index
      %c0_32 = arith.constant 0 : index
      %c0_33 = arith.constant 0 : index
      %45 = vector.load %arg7[%c2_31, %c0_32, %c0_33] : memref<4x1x32xf32, #tpu.memory_space<vmem>>, vector<1x1x32xf32>
      %46 = vector.shape_cast %45 : vector<1x1x32xf32> to vector<1x32xf32>
      %47 = vector.broadcast %46 : vector<1x32xf32> to vector<128x32xf32>
      %48 = arith.addf %44, %47 : vector<128x32xf32>
      %c0_34 = arith.constant 0 : index
      %c0_35 = arith.constant 0 : index
      %49 = vector.load %arg9[%c0_34, %c0_35] : memref<128x32xf32, #tpu.memory_space<vmem>>, vector<128x32xf32>
      %50 = vector.extract_strided_slice %3 {offsets = [0, 2], sizes = [128, 1], strides = [1, 1]} : vector<128x4xf32> to vector<128x1xf32>
      %51 = vector.broadcast %50 : vector<128x1xf32> to vector<128x32xf32>
      %52 = arith.mulf %51, %48 : vector<128x32xf32>
      %53 = arith.addf %49, %52 : vector<128x32xf32>
      %c0_36 = arith.constant 0 : index
      %c0_37 = arith.constant 0 : index
      %54 = vector.load %arg9[%c0_36, %c0_37] : memref<128x32xf32, #tpu.memory_space<vmem>>, vector<128x32xf32>
      tpu.vector_store %arg9[%c0_36, %c0_37], %53 {strides = array<i32>} : memref<128x32xf32, #tpu.memory_space<vmem>>, vector<128x32xf32>,
    } else {
    }
    %19 = arith.index_cast %arg0 : i32 to index
    %c3 = arith.constant 3 : index
    %20 = memref.load %arg1[%19, %c3] : memref<1x4xi32, #tpu.memory_space<smem>>
    %c0_i32_11 = arith.constant 0 : i32
    %21 = arith.cmpi ne, %20, %c0_i32_11 : i32
    %22 = arith.extui %21 : i1 to i32
    %c0_i32_12 = arith.constant 0 : i32
    %23 = arith.cmpi ne, %22, %c0_i32_12 : i32
    scf.if %23 {
      %c3_17 = arith.constant 3 : index
      %c0_18 = arith.constant 0 : index
      %c0_19 = arith.constant 0 : index
      %26 = vector.load %arg4[%c3_17, %c0_18, %c0_19] : memref<4x32x64xbf16, #tpu.memory_space<vmem>>, vector<1x32x64xbf16>
      %27 = vector.shape_cast %26 : vector<1x32x64xbf16> to vector<32x64xbf16>
      %cst_20 = arith.constant dense<0.000000e+00> : vector<128x64xf32>
      %28 = tpu.matmul %2, %27, %cst_20 {dimension_numbers = #tpu.dot_dimension_numbers<[1], [0], [0], [1], [0, 0, 1, 1], [], []>} : vector<128x32xbf16>, vector<32x64xbf16>, vector<128x64xf32> -> vector<128x64xf32>
      %c3_21 = arith.constant 3 : index
      %c0_22 = arith.constant 0 : index
      %c0_23 = arith.constant 0 : index
      %29 = vector.load %arg5[%c3_21, %c0_22, %c0_23] : memref<4x1x64xf32, #tpu.memory_space<vmem>>, vector<1x1x64xf32>
      %30 = vector.shape_cast %29 : vector<1x1x64xf32> to vector<1x64xf32>
      %31 = vector.broadcast %30 : vector<1x64xf32> to vector<128x64xf32>
      %32 = arith.addf %28, %31 : vector<128x64xf32>
      %cst_24 = arith.constant 5.000000e-01 : f32
      %33 = vector.broadcast %cst_24 : f32 to vector<128x64xf32>
      %34 = arith.mulf %33, %32 : vector<128x64xf32>
      %cst_25 = arith.constant 0.707106769 : f32
      %35 = vector.broadcast %cst_25 : f32 to vector<128x64xf32>
      %36 = arith.mulf %32, %35 : vector<128x64xf32>
      %37 = math.erf %36 : vector<128x64xf32>
      %cst_26 = arith.constant 1.000000e+00 : f32
      %38 = vector.broadcast %cst_26 : f32 to vector<128x64xf32>
      %39 = arith.addf %38, %37 : vector<128x64xf32>
      %40 = arith.mulf %34, %39 : vector<128x64xf32>
      %41 = arith.truncf %40 : vector<128x64xf32> to vector<128x64xbf16>
      %c3_27 = arith.constant 3 : index
      %c0_28 = arith.constant 0 : index
      %c0_29 = arith.constant 0 : index
      %42 = vector.load %arg6[%c3_27, %c0_28, %c0_29] : memref<4x64x32xbf16, #tpu.memory_space<vmem>>, vector<1x64x32xbf16>
      %43 = vector.shape_cast %42 : vector<1x64x32xbf16> to vector<64x32xbf16>
      %cst_30 = arith.constant dense<0.000000e+00> : vector<128x32xf32>
      %44 = tpu.matmul %41, %43, %cst_30 {dimension_numbers = #tpu.dot_dimension_numbers<[1], [0], [0], [1], [0, 0, 1, 1], [], []>} : vector<128x64xbf16>, vector<64x32xbf16>, vector<128x32xf32> -> vector<128x32xf32>
      %c3_31 = arith.constant 3 : index
      %c0_32 = arith.constant 0 : index
      %c0_33 = arith.constant 0 : index
      %45 = vector.load %arg7[%c3_31, %c0_32, %c0_33] : memref<4x1x32xf32, #tpu.memory_space<vmem>>, vector<1x1x32xf32>
      %46 = vector.shape_cast %45 : vector<1x1x32xf32> to vector<1x32xf32>
      %47 = vector.broadcast %46 : vector<1x32xf32> to vector<128x32xf32>
      %48 = arith.addf %44, %47 : vector<128x32xf32>
      %c0_34 = arith.constant 0 : index
      %c0_35 = arith.constant 0 : index
      %49 = vector.load %arg9[%c0_34, %c0_35] : memref<128x32xf32, #tpu.memory_space<vmem>>, vector<128x32xf32>
      %50 = vector.extract_strided_slice %3 {offsets = [0, 3], sizes = [128, 1], strides = [1, 1]} : vector<128x4xf32> to vector<128x1xf32>
      %51 = vector.broadcast %50 : vector<128x1xf32> to vector<128x32xf32>
      %52 = arith.mulf %51, %48 : vector<128x32xf32>
      %53 = arith.addf %49, %52 : vector<128x32xf32>
      %c0_36 = arith.constant 0 : index
      %c0_37 = arith.constant 0 : index
      %54 = vector.load %arg9[%c0_36, %c0_37] : memref<128x32xf32, #tpu.memory_space<vmem>>, vector<128x32xf32>
      tpu.vector_store %arg9[%c0_36, %c0_37], %53 {strides = array<i32>} : memref<128x32xf32, #tpu.memory_space<vmem>>, vector<128x32xf32>,
    } else {
    }
    %c0_13 = arith.constant 0 : index
    %c0_14 = arith.constant 0 : index
    %24 = vector.load %arg9[%c0_13, %c0_14] : memref<128x32xf32, #tpu.memory_space<vmem>>, vector<128x32xf32>
    %c0_15 = arith.constant 0 : index
    %c0_16 = arith.constant 0 : index
    %25 = vector.load %arg8[%c0_15, %c0_16] : memref<128x32xf32, #tpu.memory_space<vmem>>, vector<128x32xf32>
    tpu.vector_store %arg8[%c0_15, %c0_16], %24 {strides = array<i32>} : memref<128x32xf32, #tpu.memory_space<vmem>>, vector<128x32xf32>,
    return
  }
  func.func @transform_0(%arg0: i32, %arg1: memref<1x4xi32, #tpu.memory_space<smem>>) -> (i32, i32) {
    %c0_i32 = arith.constant 0 : i32
    %c0_i32_0 = arith.constant 0 : i32
    return %arg0, %c0_i32 : i32, i32
  }
  func.func @transform_1(%arg0: i32, %arg1: memref<1x4xi32, #tpu.memory_space<smem>>) -> (i32, i32) {
    %c0_i32 = arith.constant 0 : i32
    %c0_i32_0 = arith.constant 0 : i32
    return %arg0, %c0_i32 : i32, i32
  }
  func.func @transform_2(%arg0: i32, %arg1: memref<1x4xi32, #tpu.memory_space<smem>>) -> (i32, i32, i32) {
    %c0_i32 = arith.constant 0 : i32
    %c0_i32_0 = arith.constant 0 : i32
    %c0_i32_1 = arith.constant 0 : i32
    %c0_i32_2 = arith.constant 0 : i32
    return %c0_i32, %c0_i32_0, %c0_i32_1 : i32, i32, i32
  }
  func.func @transform_3(%arg0: i32, %arg1: memref<1x4xi32, #tpu.memory_space<smem>>) -> (i32, i32, i32) {
    %c0_i32 = arith.constant 0 : i32
    %c0_i32_0 = arith.constant 0 : i32
    %c0_i32_1 = arith.constant 0 : i32
    %c0_i32_2 = arith.constant 0 : i32
    return %c0_i32, %c0_i32_0, %c0_i32_1 : i32, i32, i32
  }
  func.func @transform_4(%arg0: i32, %arg1: memref<1x4xi32, #tpu.memory_space<smem>>) -> (i32, i32, i32) {
    %c0_i32 = arith.constant 0 : i32
    %c0_i32_0 = arith.constant 0 : i32
    %c0_i32_1 = arith.constant 0 : i32
    %c0_i32_2 = arith.constant 0 : i32
    return %c0_i32, %c0_i32_0, %c0_i32_1 : i32, i32, i32
  }
  func.func @transform_5(%arg0: i32, %arg1: memref<1x4xi32, #tpu.memory_space<smem>>) -> (i32, i32, i32) {
    %c0_i32 = arith.constant 0 : i32
    %c0_i32_0 = arith.constant 0 : i32
    %c0_i32_1 = arith.constant 0 : i32
    %c0_i32_2 = arith.constant 0 : i32
    return %c0_i32, %c0_i32_0, %c0_i32_1 : i32, i32, i32
  }
  func.func @transform_6(%arg0: i32, %arg1: memref<1x4xi32, #tpu.memory_space<smem>>) -> (i32, i32) {
    %c0_i32 = arith.constant 0 : i32
    %c0_i32_0 = arith.constant 0 : i32
    return %arg0, %c0_i32 : i32, i32
  }
}

</mosaic_0001>

<bundles_post_ra>
// kernel: tpu_custom_call.1
= control target key start
LH: loop header
LB: loop body
LE: loop exit
PB: predicated region body
PF: predicated region fallthrough
CT: control target
= control target key end

     0   :  { %s3914_s0 = inlined_call_operand.vmem [shape: s32[1,4], index: 0, kind: input, shape index: {}]   ;;  %s3915_s1 = inlined_call_operand.vmem [shape: bf16[128,32], index: 1, kind: input, shape index: {}]   ;;  %s3916_s2 = inlined_call_operand.vmem [shape: f32[128,4], index: 2, kind: input, shape index: {}]   ;;  %s3917_s3 = inlined_call_operand.vmem [shape: bf16[4,32,64], index: 3, kind: input, shape index: {}]   ;;  %s3918_s4 = inlined_call_operand.vmem [shape: f32[4,1,64], index: 4, kind: input, shape index: {}]   ;;  %s3919_s5 = inlined_call_operand.vmem [shape: bf16[4,64,32], index: 5, kind: input, shape index: {}]   ;;  %s3920_s6 = inlined_call_operand.vmem [shape: f32[4,1,32], index: 6, kind: input, shape index: {}]   ;;  %s3921_s7 = inlined_call_operand.vmem [shape: f32[128,32], index: 7, kind: output, shape index: {}]  }
   0x1   :  { %s12_s26 = sshll.u32 %s3914_s0, 4  ;;  %s13_s26 = int_to_ptr.vmem [resolvable:$true] %s12_s26 }
   0x2   :  { %s3067_s27 = scalar_lea.vmem %s13_s26, 16  ;;  %p3072_p1 = scmp.lt.s32.totalorder %s13_s26, %s13_s26 }
   0x3   :  { %p3068_p0 = scmp.ne.s32.totalorder %s13_s26, %s3067_s27  ;;  %p3073_p2 = scmp.lt.s32.totalorder %s3067_s27, %s3067_s27 }
   0x5   :  { %p3074_p3 = por %p3073_p2, %p3072_p1 }
   0x7   :  { %p3075_p4 = pnand %p3074_p3, %p3068_p0 }
   0x9   :  { %3078 = shalt.err (!%p3075_p4)  }
   0xa   :  { %s3081_s28 = smov [#allocation4]  }
   0xb   :  { %15 = dma.vmem_to_smem %s13_s26, 16, %s3081_s28, [#allocation3] }
   0xc   :  { %3079 = dma.done.wait [#allocation3], 16 }
   0xd   :  { %3080 = vsyncadd [#allocation3], 4294967280 }
   0xe   :  { %17 = sfence }
   0xf   :  { %vm31_vm0 = vcmask 261120   ;;  %v3133_v0 = vld [vmem:[%s3915_s1] sm:$0xf]  ;;  %v3138_v1 = vld [vmem:[%s3915_s1 + $0x4] sm:$0xf]  ;;  %v3082_v2 = vmov 0.0  }
  0x10   :  { %32 = vst.msk [vmem:[#allocation2] sm:$0xff] %vm31_vm0, %v3082_v2  ;;  %33 = vst.msk [vmem:[#allocation2 + $0x8] sm:$0xff] %vm31_vm0, %v3082_v2  ;;  %v3159_v3 = vld [vmem:[%s3915_s1 + $0x8] sm:$0xf]  ;;  %v3164_v4 = vld [vmem:[%s3915_s1 + $0xc] sm:$0xf] }
  0x11   :  { %34 = vst.msk [vmem:[#allocation2 + $0x10] sm:$0xff] %vm31_vm0, %v3082_v2  ;;  %35 = vst.msk [vmem:[#allocation2 + $0x18] sm:$0xff] %vm31_vm0, %v3082_v2  ;;  %v3169_v5 = vld [vmem:[%s3915_s1 + $0x10] sm:$0xf]  ;;  %v3174_v6 = vld [vmem:[%s3915_s1 + $0x14] sm:$0xf] }
  0x12   :  { %36 = vst.msk [vmem:[#allocation2 + $0x20] sm:$0xff] %vm31_vm0, %v3082_v2  ;;  %37 = vst.msk [vmem:[#allocation2 + $0x28] sm:$0xff] %vm31_vm0, %v3082_v2  ;;  %v3179_v7 = vld [vmem:[%s3915_s1 + $0x18] sm:$0xf]  ;;  %v3184_v8 = vld [vmem:[%s3915_s1 + $0x1c] sm:$0xf] }
  0x13   :  { %38 = vst.msk [vmem:[#allocation2 + $0x30] sm:$0xff] %vm31_vm0, %v3082_v2  ;;  %39 = vst.msk [vmem:[#allocation2 + $0x38] sm:$0xff] %vm31_vm0, %v3082_v2  ;;  %v3189_v9 = vld [vmem:[%s3915_s1 + $0x20] sm:$0xf]  ;;  %v3194_v10 = vld [vmem:[%s3915_s1 + $0x24] sm:$0xf] }
  0x14   :  { %40 = vst.msk [vmem:[#allocation2 + $0x40] sm:$0xff] %vm31_vm0, %v3082_v2  ;;  %41 = vst.msk [vmem:[#allocation2 + $0x48] sm:$0xff] %vm31_vm0, %v3082_v2  ;;  %v3199_v11 = vld [vmem:[%s3915_s1 + $0x28] sm:$0xf]  ;;  %v3204_v12 = vld [vmem:[%s3915_s1 + $0x2c] sm:$0xf] }
  0x15   :  { %42 = vst.msk [vmem:[#allocation2 + $0x50] sm:$0xff] %vm31_vm0, %v3082_v2  ;;  %43 = vst.msk [vmem:[#allocation2 + $0x58] sm:$0xff] %vm31_vm0, %v3082_v2  ;;  %v3209_v13 = vld [vmem:[%s3915_s1 + $0x30] sm:$0xf]  ;;  %v3214_v14 = vld [vmem:[%s3915_s1 + $0x34] sm:$0xf] }
  0x16   :  { %44 = vst.msk [vmem:[#allocation2 + $0x60] sm:$0xff] %vm31_vm0, %v3082_v2  ;;  %45 = vst.msk [vmem:[#allocation2 + $0x68] sm:$0xff] %vm31_vm0, %v3082_v2  ;;  %v3219_v15 = vld [vmem:[%s3915_s1 + $0x38] sm:$0xf]  ;;  %v3224_v16 = vld [vmem:[%s3915_s1 + $0x3c] sm:$0xf] }
  0x17   :  { %46 = vst.msk [vmem:[#allocation2 + $0x70] sm:$0xff] %vm31_vm0, %v3082_v2  ;;  %47 = vst.msk [vmem:[#allocation2 + $0x78] sm:$0xff] %vm31_vm0, %v3082_v2  ;;  %v3229_v17 = vld [vmem:[%s3916_s2] sm:$0xff]  ;;  %v3234_v18 = vld [vmem:[%s3916_s2 + $0x8] sm:$0xff]  ;;  %s81_s1 = sld [smem:[#allocation4]] }
  0x18   :  { %v3239_v19 = vld [vmem:[%s3916_s2 + $0x10] sm:$0xff]  ;;  %v3244_v20 = vld [vmem:[%s3916_s2 + $0x18] sm:$0xff]  ;;  %v3249_v21 = vld [vmem:[%s3916_s2 + $0x20] sm:$0xff] }
  0x19   :  { %v3254_v22 = vld [vmem:[%s3916_s2 + $0x28] sm:$0xff]  ;;  %v3259_v23 = vld [vmem:[%s3916_s2 + $0x30] sm:$0xff]  ;;  %v3264_v24 = vld [vmem:[%s3916_s2 + $0x38] sm:$0xff] }
  0x1a   :  { %v3269_v25 = vld [vmem:[%s3916_s2 + $0x40] sm:$0xff]  ;;  %v3274_v26 = vld [vmem:[%s3916_s2 + $0x48] sm:$0xff]  ;;  %v3279_v27 = vld [vmem:[%s3916_s2 + $0x50] sm:$0xff] }
  0x1b   :  { %v3284_v28 = vld [vmem:[%s3916_s2 + $0x58] sm:$0xff]  ;;  %v3289_v29 = vld [vmem:[%s3916_s2 + $0x60] sm:$0xff]  ;;  %v3294_v30 = vld [vmem:[%s3916_s2 + $0x68] sm:$0xff] }
  0x1c   :  { %v3299_v31 = vld [vmem:[%s3916_s2 + $0x70] sm:$0xff]  ;;  %v3304_v32 = vld [vmem:[%s3916_s2 + $0x78] sm:$0xff] }
  0x1d   :  { %3923 = vst [vmem:[#allocation6_spill] sm:$0xff] %v3299_v31  ;;  %p2460_p5 = scmp.eq.s32.totalorder %s81_s1, 0 }
  0x1e   :  { %v2909_v33 = vld [vmem:[%s3917_s3] sm:$0xff] (!%p2460_p5)   ;;  %v2462_v34 = vcombine.low (!%p2460_p5), %v3133_v0, %v3138_v1  ;;  %v2910_v35 = vld [vmem:[%s3917_s3 + $0x8] sm:$0xff] (!%p2460_p5)   ;;  %v2463_v36 = vcombine.low (!%p2460_p5), %v3159_v3, %v3164_v4  ;;  %v2464_v37 = vcombine.low (!%p2460_p5), %v3169_v5, %v3174_v6  ;;  %v2465_v38 = vcombine.low (!%p2460_p5), %v3179_v7, %v3184_v8  ;;  %v2913_v45 = vld [vmem:[%s3919_s5 + $0x10] sm:$0xff] (!%p2460_p5)  }
  0x1f   :  { %85 = sbr.rel (%p2460_p5) target bundleno = 522 (0x20a), region = 29  ;;  %2725 = vmatprep.subr.bf16.mxu0 (!%p2460_p5), %v2909_v33  ;;  %v2466_v39 = vcombine.low (!%p2460_p5), %v3189_v9, %v3194_v10  ;;  %v2467_v40 = vcombine.low (!%p2460_p5), %v3199_v11, %v3204_v12  ;;  %v2468_v41 = vcombine.low (!%p2460_p5), %v3209_v13, %v3214_v14  ;;  %v2469_v42 = vcombine.low (!%p2460_p5), %v3219_v15, %v3224_v16  ;;  %v2911_v43 = vld [vmem:[%s3919_s5] sm:$0xff] (!%p2460_p5)   ;;  %v2912_v44 = vld [vmem:[%s3919_s5 + $0x8] sm:$0xff] (!%p2460_p5)   ;;  %v2914_v46 = vld [vmem:[%s3919_s5 + $0x18] sm:$0xff] (!%p2460_p5)  }
  0x20   :  { %2729 = vmatprep.mubr.msk.bf16.mxu0 (!%p2460_p5), %vm31_vm0, %v2462_v34  ;;  %2726 = vmatpush3.bf16.msra.mxu0 (!%p2460_p5), %v2909_v33  ;;  %v3083_v47 = vmov (!%p2460_p5), 0   ;;  %v3367_v48 = vld [vmem:[%s3918_s4] ss:$0 sm:$0xff] (!%p2460_p5)  ;;  %vm397_vm1 = vcmask (!%p2460_p5), 523264  }
  0x21   :  { %2727 = vmatprep.subr.bf16.mxu0 (!%p2460_p5), %v2910_v35  ;;  %2745 = vmatprep.subr.bf16.mxu1 (!%p2460_p5), %v2911_v43 }
  0x22   :  { %2746 = vmatpush3.bf16.msra.mxu1 (!%p2460_p5), %v2911_v43  ;;  %2908 = vset.pattern.permute.xlu1 (!%p2460_p5), %v3083_v47 }
  0x23   :  { %2747 = vmatprep.subr.bf16.mxu1 (!%p2460_p5), %v2912_v44  ;;  %2907 = vset.pattern.permute.xlu0 (!%p2460_p5), %v3083_v47 }
  0x24   :  { %2728 = vmatpush3.bf16.msra.mxu0 (!%p2460_p5), %v2910_v35  ;;  %547 = vperm.xlu1 (!%p2460_p5), %2908, %v3239_v19  }
  0x25   :  { %537 = vperm.xlu0 (!%p2460_p5), %2907, %v3229_v17  }
  0x26   :  { %2748 = vmatpush3.bf16.msra.mxu1 %v2912_v44 }
  0x27   :  { %2730 = vmatmul.mubr.msk.bf16.vlgmr.msra.gmra.mrb[0].mxu0 %vm31_vm0, %v2463_v36  ;;  %2749 = vmatprep.subr.bf16.mxu1 %v2913_v45 }
  0x28   :  { %2733 = vmatprep.mubr.msk.bf16.mxu0 %vm31_vm0, %v2464_v37  ;;  %552 = vperm.xlu1 %2908, %v3244_v20  }
  0x29   :  { %542 = vperm.xlu0 %2907, %v3234_v18  }
  0x2a   :  { %2750 = vmatpush3.bf16.msra.mxu1 %v2913_v45 }
  0x2b   :  { %2751 = vmatprep.subr.bf16.mxu1 %v2914_v46 }
  0x2c   :  { %562 = vperm.xlu1 %2908, %v3254_v22  }
  0x2d   :  { %557 = vperm.xlu0 %2907, %v3249_v21  }
  0x2e   :  { %2752 = vmatpush3.bf16.msra.mxu1 %v2914_v46 }
  0x2f   :  { %2734 = vmatmul.mubr.msk.bf16.gmra.mrb[4].mxu0 %vm31_vm0, %v2465_v38 }
  0x30   :  { %2737 = vmatprep.mubr.msk.bf16.mxu0 %vm31_vm0, %v2466_v39  ;;  %572 = vperm.xlu1 %2908, %v3264_v24  }
  0x31   :  { %567 = vperm.xlu0 %2907, %v3259_v23  }
  0x34   :  { %582 = vperm.xlu1 %2908, %v3274_v26  }
  0x35   :  { %577 = vperm.xlu0 %2907, %v3269_v25  }
  0x37   :  { %2738 = vmatmul.mubr.msk.bf16.gmra.mrb[8].mxu0 %vm31_vm0, %v2467_v40 }
  0x38   :  { %2741 = vmatprep.mubr.msk.bf16.mxu0 %vm31_vm0, %v2468_v41  ;;  %592 = vperm.xlu1 %2908, %v3284_v28  }
  0x39   :  { %587 = vperm.xlu0 %2907, %v3279_v27  }
  0x3c   :  { %602 = vperm.xlu1 %2908, %v3294_v30  }
  0x3d   :  { %597 = vperm.xlu0 %2907, %v3289_v29  }
  0x3f   :  { %2742 = vmatmul.mubr.msk.bf16.gmra.mrb[12].mxu0 %vm31_vm0, %v2469_v42 }
  0x40   :  { %612 = vperm.xlu1 %2908, %v3304_v32  }
  0x41   :  { %607 = vperm.xlu0 %2907, %v3299_v31  }
  0xfa   :  { %v2731_v49 = vpop.f32.mrb[0].mxu0 }
  0xfb   :  { %v216_v50 = vadd.f32 %v2731_v49, %v3367_v48  ;;  %v207_v51 = vpop.f32.mrb[1].mxu0 }
  0xfc   :  { %v208_v52 = vadd.f32 %v3367_v48, %v207_v51  ;;  %v2732_v53 = vpop.f32.mrb[2].mxu0 }
  0xfd   :  { %v288_v54 = vmul.f32 0.70710677, %v216_v50  ;;  %v219_v55 = vadd.f32 %v2732_v53, %v3367_v48  ;;  %v210_v56 = vpop.f32.mrb[3].mxu0  ;;  %v272_v51 = vmul.f32 0.5, %v216_v50 }
  0xfe   :  { %v286_v57 = vmul.f32 0.70710677, %v208_v52  ;;  %v211_v58 = vadd.f32 %v3367_v48, %v210_v56 }
  0xff   :  { %2915 = verf.f32 %v288_v54  ;;  %v289_v59 = vmul.f32 0.70710677, %v219_v55  ;;  %v273_v53 = vmul.f32 0.5, %v219_v55  ;;  %v270_v55 = vmul.f32 0.5, %v208_v52 }
 0x100   :  { %2917 = verf.f32 %v286_v57  ;;  %v287_v60 = vmul.f32 0.70710677, %v211_v58 }
 0x101   :  { %2919 = verf.f32 %v289_v59 }
 0x102   :  { %2921 = verf.f32 %v287_v60  ;;  %v2735_v61 = vpop.f32.mrb[4].mxu0 }
 0x103   :  { %v232_v62 = vadd.f32 %v2735_v61, %v3367_v48  ;;  %v223_v63 = vpop.f32.mrb[5].mxu0 }
 0x104   :  { %v224_v2 = vadd.f32 %v3367_v48, %v223_v63  ;;  %v2736_v33 = vpop.f32.mrb[6].mxu0 }
 0x105   :  { %v292_v34 = vmul.f32 0.70710677, %v232_v62  ;;  %v235_v35 = vadd.f32 %v2736_v33, %v3367_v48  ;;  %v226_v36 = vpop.f32.mrb[7].mxu0 }
 0x106   :  { %v290_v37 = vmul.f32 0.70710677, %v224_v2  ;;  %v227_v38 = vadd.f32 %v3367_v48, %v226_v36 }
 0x107   :  { %2923 = verf.f32 %v292_v34  ;;  %v293_v39 = vmul.f32 0.70710677, %v235_v35 }
 0x108   :  { %2925 = verf.f32 %v290_v37  ;;  %v291_v40 = vmul.f32 0.70710677, %v227_v38 }
 0x109   :  { %v2916_v41 = vpop.eup %2915  ;;  %2927 = verf.f32 %v293_v39  ;;  %v271_v39 = vmul.f32 0.5, %v211_v58 }
 0x10a   :  { %v2918_v42 = vpop.eup %2917  ;;  %v320_v43 = vadd.f32 1.0, %v2916_v41  ;;  %2929 = verf.f32 %v291_v40  ;;  %v2739_v44 = vpop.f32.mrb[8].mxu0 }
 0x10b   :  { %v2920_v45 = vpop.eup %2919  ;;  %v3378_v46 = vadd.f32 %v2739_v44, %v3367_v48  ;;  %v239_v47 = vpop.f32.mrb[9].mxu0  ;;  %v318_v63 = vadd.f32 1.0, %v2918_v42 }
 0x10c   :  { %v2922_v49 = vpop.eup %2921  ;;  %v321_v54 = vadd.f32 1.0, %v2920_v45  ;;  %v3381_v56 = vadd.f32 %v3367_v48, %v239_v47  ;;  %v2740_v57 = vpop.f32.mrb[10].mxu0  ;;  %v336_v34 = vmul.f32 %v320_v43, %v272_v51 }
 0x10d   :  { %v296_v59 = vmul.f32 0.70710677, %v3378_v46  ;;  %v3385_v60 = vadd.f32 %v2740_v57, %v3367_v48  ;;  %v242_v61 = vpop.f32.mrb[11].mxu0  ;;  %v319_v33 = vadd.f32 1.0, %v2922_v49  ;;  %v334_v47 = vmul.f32 %v318_v63, %v270_v55 }
 0x10e   :  { %v337_v36 = vmul.f32 %v321_v54, %v273_v53  ;;  %v294_v37 = vmul.f32 0.70710677, %v3381_v56  ;;  %v243_v50 = vadd.f32 %v3367_v48, %v242_v61  ;;  %v276_v61 = vmul.f32 0.5, %v232_v62 }
 0x10f   :  { %2931 = verf.f32 %v296_v59  ;;  %v297_v40 = vmul.f32 0.70710677, %v3385_v60  ;;  %v335_v57 = vmul.f32 %v319_v33, %v271_v39  ;;  %v274_v63 = vmul.f32 0.5, %v224_v2 }
 0x110   :  { %v351_v41 = vpack.c.bf16 %v337_v36, %v336_v34  ;;  %2933 = verf.f32 %v294_v37  ;;  %v295_v44 = vmul.f32 0.70710677, %v243_v50  ;;  %v277_v34 = vmul.f32 0.5, %v235_v35 }
 0x111   :  { %v2924_v45 = vpop.eup %2923  ;;  %2935 = verf.f32 %v297_v40  ;;  %v350_v54 = vpack.c.bf16 %v335_v57, %v334_v47  ;;  %v275_v33 = vmul.f32 0.5, %v227_v38 }
 0x112   :  { %v2926_v42 = vpop.eup %2925  ;;  %v324_v49 = vadd.f32 1.0, %v2924_v45  ;;  %2937 = verf.f32 %v295_v44  ;;  %v2743_v43 = vpop.f32.mrb[12].mxu0 }
 0x113   :  { %v2928_v51 = vpop.eup %2927  ;;  %v322_v53 = vadd.f32 1.0, %v2926_v42  ;;  %v264_v52 = vadd.f32 %v2743_v43, %v3367_v48  ;;  %v255_v58 = vpop.f32.mrb[13].mxu0  ;;  %2753 = vmatprep.mubr.msk.bf16.mxu1 %vm397_vm1, %v350_v54 }
 0x114   :  { %v2930_v59 = vpop.eup %2929  ;;  %v325_v36 = vadd.f32 1.0, %v2928_v51  ;;  %v256_v37 = vadd.f32 %v3367_v48, %v255_v58  ;;  %v2744_v40 = vpop.f32.mrb[14].mxu0  ;;  %v340_v45 = vmul.f32 %v324_v49, %v276_v61  ;;  %2754 = vmatmul.mubr.msk.bf16.vlgmr.msra.gmra.mrb[0].mxu1 %vm397_vm1, %v351_v41 }
 0x115   :  { %v323_v55 = vadd.f32 1.0, %v2930_v59  ;;  %v300_v39 = vmul.f32 0.70710677, %v264_v52  ;;  %v258_v44 = vpop.f32.mrb[15].mxu0  ;;  %v267_v43 = vadd.f32 %v2744_v40, %v3367_v48  ;;  %v338_v62 = vmul.f32 %v322_v53, %v274_v63 }
 0x116   :  { %v341_v42 = vmul.f32 %v325_v36, %v277_v34  ;;  %v298_v31 = vmul.f32 0.70710677, %v256_v37  ;;  %v259_v47 = vadd.f32 %v3367_v48, %v258_v44  ;;  %v280_v53 = vmul.f32 0.5, %v3378_v46 }
 0x117   :  { %v339_v35 = vmul.f32 %v323_v55, %v275_v33  ;;  %2939 = verf.f32 %v300_v39  ;;  %v301_v2 = vmul.f32 0.70710677, %v267_v43  ;;  %v281_v34 = vmul.f32 0.5, %v3385_v60 }
 0x118   :  { %v353_v57 = vpack.c.bf16 %v341_v42, %v340_v45  ;;  %2941 = verf.f32 %v298_v31  ;;  %v299_v58 = vmul.f32 0.70710677, %v259_v47  ;;  %v278_v31 = vmul.f32 0.5, %v3381_v56 }
 0x119   :  { %v2932_v38 = vpop.eup %2931  ;;  %v352_v51 = vpack.c.bf16 %v339_v35, %v338_v62  ;;  %2943 = verf.f32 %v301_v2  ;;  %v279_v36 = vmul.f32 0.5, %v243_v50  ;;  %v285_v56 = vmul.f32 0.5, %v267_v43 }
 0x11a   :  { %v2934_v54 = vpop.eup %2933  ;;  %v328_v59 = vadd.f32 1.0, %v2932_v38  ;;  %2945 = verf.f32 %v299_v58  ;;  %v284_v38 = vmul.f32 0.5, %v264_v52  ;;  %v283_v58 = vmul.f32 0.5, %v259_v47  ;;  %v3408_v47 = vld [vmem:[%s3920_s6] ss:$0 sm:$0xff] }
 0x11b   :  { %v2936_v49 = vpop.eup %2935  ;;  %v326_v61 = vadd.f32 1.0, %v2934_v54  ;;  %2757 = vmatprep.mubr.msk.bf16.mxu1 %vm397_vm1, %v352_v51  ;;  %v282_v51 = vmul.f32 0.5, %v256_v37 }
 0x11c   :  { %v2938_v41 = vpop.eup %2937  ;;  %v329_v48 = vadd.f32 1.0, %v2936_v49  ;;  %v344_v63 = vmul.f32 %v328_v59, %v280_v53  ;;  %2758 = vmatmul.mubr.msk.bf16.gmra.mrb[4].mxu1 %vm397_vm1, %v353_v57 }
 0x11d   :  { %v327_v40 = vadd.f32 1.0, %v2938_v41  ;;  %v342_v55 = vmul.f32 %v326_v61, %v278_v31 }
 0x11e   :  { %v345_v33 = vmul.f32 %v329_v48, %v281_v34  ;;  %v538_v34 = vpop.permute.xlu0 %537  ;;  %v548_v48 = vpop.permute.xlu1 %547 }
 0x11f   :  { %v343_v39 = vmul.f32 %v327_v40, %v279_v36 }
 0x120   :  { %v355_v44 = vpack.c.bf16 %v345_v33, %v344_v63 }
 0x121   :  { %v2940_v45 = vpop.eup %2939  ;;  %v354_v42 = vpack.c.bf16 %v343_v39, %v342_v55  ;;  %v521_v55 = vld [vmem:[#allocation2 + $0x10] sm:$0xff] }
 0x122   :  { %v2942_v62 = vpop.eup %2941  ;;  %v332_v35 = vadd.f32 1.0, %v2940_v45  ;;  %v543_v52 = vpop.permute.xlu0 %542 }
 0x123   :  { %2761 = vmatprep.mubr.msk.bf16.mxu1 %vm397_vm1, %v354_v42  ;;  %v2944_v46 = vpop.eup %2943  ;;  %v330_v60 = vadd.f32 1.0, %v2942_v62  ;;  %v553_v43 = vpop.permute.xlu1 %552  ;;  %v519_v42 = vld [vmem:[#allocation2] sm:$0xff] }
 0x124   :  { %v2946_v2 = vpop.eup %2945  ;;  %v333_v50 = vadd.f32 1.0, %v2944_v46  ;;  %2762 = vmatmul.mubr.msk.bf16.gmra.mrb[8].mxu1 %vm397_vm1, %v355_v44  ;;  %v348_v57 = vmul.f32 %v332_v35, %v284_v38 }
 0x125   :  { %v331_v54 = vadd.f32 1.0, %v2946_v2  ;;  %v346_v49 = vmul.f32 %v330_v60, %v282_v51  ;;  %v522_v2 = vld [vmem:[#allocation2 + $0x18] sm:$0xff]  ;;  %v520_v51 = vld [vmem:[#allocation2 + $0x8] sm:$0xff] }
 0x126   :  { %v349_v59 = vmul.f32 %v333_v50, %v285_v56  ;;  %v558_v31 = vpop.permute.xlu0 %557 }
 0x127   :  { %v347_v61 = vmul.f32 %v331_v54, %v283_v58  ;;  %v563_v37 = vpop.permute.xlu1 %562 }
 0x128   :  { %v357_v41 = vpack.c.bf16 %v349_v59, %v348_v57 }
 0x129   :  { %v356_v53 = vpack.c.bf16 %v347_v61, %v346_v49 }
 0x12a   :  { %v568_v33 = vpop.permute.xlu0 %567 }
 0x12b   :  { %2765 = vmatprep.mubr.msk.bf16.mxu1 %vm397_vm1, %v356_v53  ;;  %v573_v46 = vpop.permute.xlu1 %572 }
 0x12c   :  { %2766 = vmatmul.mubr.msk.bf16.gmra.mrb[12].mxu1 %vm397_vm1, %v357_v41 }
 0x12e   :  { %v578_v59 = vpop.permute.xlu0 %577 }
 0x1e7   :  { %v2755_v36 = vpop.f32.mrb[0].mxu1 }
 0x1e8   :  { %v465_v40 = vadd.f32 %v2755_v36, %v3408_v47  ;;  %v456_v63 = vpop.f32.mrb[1].mxu1 }
 0x1e9   :  { %v457_v39 = vadd.f32 %v3408_v47, %v456_v63  ;;  %v2756_v44 = vpop.f32.mrb[2].mxu1 }
 0x1ea   :  { %v617_v45 = vmul.f32 %v548_v48, %v465_v40  ;;  %v468_v62 = vadd.f32 %v2756_v44, %v3408_v47  ;;  %v459_v35 = vpop.f32.mrb[3].mxu1  ;;  %v525_v48 = vld [vmem:[#allocation2 + $0x30] sm:$0xff]  ;;  %v523_v40 = vld [vmem:[#allocation2 + $0x20] sm:$0xff]  ;;  %v526_v44 = vld [vmem:[#allocation2 + $0x38] sm:$0xff] }
 0x1eb   :  { %v615_v60 = vmul.f32 %v538_v34, %v457_v39  ;;  %v460_v38 = vadd.f32 %v3408_v47, %v459_v35  ;;  %v583_v34 = vpop.permute.xlu1 %582  ;;  %v524_v35 = vld [vmem:[#allocation2 + $0x28] sm:$0xff] }
 0x1ec   :  { %v633_v56 = vadd.f32 %v617_v45, %v521_v55  ;;  %v618_v50 = vmul.f32 %v553_v43, %v468_v62 }
 0x1ed   :  { %v631_v58 = vadd.f32 %v615_v60, %v519_v42  ;;  %v616_v54 = vmul.f32 %v543_v52, %v460_v38  ;;  %v588_v60 = vpop.permute.xlu0 %587 }
 0x1ee   :  { %649 = vst.msk [vmem:[#allocation2 + $0x10] sm:$0xff] %vm31_vm0, %v633_v56  ;;  %v634_v57 = vadd.f32 %v618_v50, %v522_v2 }
 0x1ef   :  { %647 = vst.msk [vmem:[#allocation2] sm:$0xff] %vm31_vm0, %v631_v58  ;;  %v632_v49 = vadd.f32 %v616_v54, %v520_v51  ;;  %v2759_v61 = vpop.f32.mrb[4].mxu1  ;;  %v593_v50 = vpop.permute.xlu1 %592 }
 0x1f0   :  { %650 = vst.msk [vmem:[#allocation2 + $0x18] sm:$0xff] %vm31_vm0, %v634_v57  ;;  %v481_v41 = vadd.f32 %v2759_v61, %v3408_v47  ;;  %v472_v53 = vpop.f32.mrb[5].mxu1 }
 0x1f1   :  { %648 = vst.msk [vmem:[#allocation2 + $0x8] sm:$0xff] %vm31_vm0, %v632_v49  ;;  %v473_v43 = vadd.f32 %v3408_v47, %v472_v53  ;;  %v2760_v52 = vpop.f32.mrb[6].mxu1  ;;  %v527_v49 = vld [vmem:[#allocation2 + $0x40] sm:$0xff]  ;;  %v598_v53 = vpop.permute.xlu0 %597 }
 0x1f2   :  { %v621_v36 = vmul.f32 %v568_v33, %v481_v41  ;;  %v484_v63 = vadd.f32 %v2760_v52, %v3408_v47  ;;  %v475_v55 = vpop.f32.mrb[7].mxu1 }
 0x1f3   :  { %v619_v39 = vmul.f32 %v558_v31, %v473_v43  ;;  %v476_v45 = vadd.f32 %v3408_v47, %v475_v55  ;;  %v530_v43 = vld [vmem:[#allocation2 + $0x58] sm:$0xff]  ;;  %v603_v55 = vpop.permute.xlu1 %602 }
 0x1f4   :  { %v637_v42 = vadd.f32 %v621_v36, %v525_v48  ;;  %v622_v62 = vmul.f32 %v573_v46, %v484_v63  ;;  %v529_v46 = vld [vmem:[#allocation2 + $0x50] sm:$0xff]  ;;  %v528_v63 = vld [vmem:[#allocation2 + $0x48] sm:$0xff] }
 0x1f5   :  { %v635_v2 = vadd.f32 %v619_v39, %v523_v40  ;;  %v620_v38 = vmul.f32 %v563_v37, %v476_v45 }
 0x1f6   :  { %653 = vst.msk [vmem:[#allocation2 + $0x30] sm:$0xff] %vm31_vm0, %v637_v42  ;;  %v638_v56 = vadd.f32 %v622_v62, %v526_v44 }
 0x1f7   :  { %651 = vst.msk [vmem:[#allocation2 + $0x20] sm:$0xff] %vm31_vm0, %v635_v2  ;;  %v636_v33 = vadd.f32 %v620_v38, %v524_v35  ;;  %v2763_v51 = vpop.f32.mrb[8].mxu1  ;;  %v533_v2 = vld [vmem:[#allocation2 + $0x70] sm:$0xff] }
 0x1f8   :  { %654 = vst.msk [vmem:[#allocation2 + $0x38] sm:$0xff] %vm31_vm0, %v638_v56  ;;  %v497_v31 = vadd.f32 %v2763_v51, %v3408_v47  ;;  %v488_v58 = vpop.f32.mrb[9].mxu1 }
 0x1f9   :  { %652 = vst.msk [vmem:[#allocation2 + $0x28] sm:$0xff] %vm31_vm0, %v636_v33  ;;  %v489_v54 = vadd.f32 %v3408_v47, %v488_v58  ;;  %v2764_v57 = vpop.f32.mrb[10].mxu1 }
 0x1fa   :  { %v625_v37 = vmul.f32 %v588_v60, %v497_v31  ;;  %v500_v61 = vadd.f32 %v2764_v57, %v3408_v47  ;;  %v491_v41 = vpop.f32.mrb[11].mxu1  ;;  %v608_v60 = vpop.permute.xlu0 %607 }
 0x1fb   :  { %v623_v48 = vmul.f32 %v578_v59, %v489_v54  ;;  %v492_v52 = vadd.f32 %v3408_v47, %v491_v41  ;;  %v613_v31 = vpop.permute.xlu1 %612 }
 0x1fc   :  { %v641_v36 = vadd.f32 %v625_v37, %v529_v46  ;;  %v626_v40 = vmul.f32 %v593_v50, %v500_v61  ;;  %v531_v50 = vld [vmem:[#allocation2 + $0x60] sm:$0xff]  ;;  %v534_v46 = vld [vmem:[#allocation2 + $0x78] sm:$0xff] }
 0x1fd   :  { %v639_v39 = vadd.f32 %v623_v48, %v527_v49  ;;  %v624_v44 = vmul.f32 %v583_v34, %v492_v52  ;;  %v532_v49 = vld [vmem:[#allocation2 + $0x68] sm:$0xff] }
 0x1fe   :  { %657 = vst.msk [vmem:[#allocation2 + $0x50] sm:$0xff] %vm31_vm0, %v641_v36  ;;  %v642_v45 = vadd.f32 %v626_v40, %v530_v43 }
 0x1ff   :  { %655 = vst.msk [vmem:[#allocation2 + $0x40] sm:$0xff] %vm31_vm0, %v639_v39  ;;  %v640_v42 = vadd.f32 %v624_v44, %v528_v63  ;;  %v2767_v62 = vpop.f32.mrb[12].mxu1 }
 0x200   :  { %658 = vst.msk [vmem:[#allocation2 + $0x58] sm:$0xff] %vm31_vm0, %v642_v45  ;;  %v513_v59 = vadd.f32 %v2767_v62, %v3408_v47  ;;  %v504_v35 = vpop.f32.mrb[13].mxu1 }
 0x201   :  { %656 = vst.msk [vmem:[#allocation2 + $0x48] sm:$0xff] %vm31_vm0, %v640_v42  ;;  %v505_v38 = vadd.f32 %v3408_v47, %v504_v35  ;;  %v2768_v56 = vpop.f32.mrb[14].mxu1 }
 0x202   :  { %v629_v34 = vmul.f32 %v608_v60, %v513_v59  ;;  %v516_v33 = vadd.f32 %v2768_v56, %v3408_v47  ;;  %v507_v51 = vpop.f32.mrb[15].mxu1 }
 0x203   :  { %v627_v58 = vmul.f32 %v598_v53, %v505_v38  ;;  %v508_v54 = vadd.f32 %v3408_v47, %v507_v51 }
 0x204   :  { %v645_v57 = vadd.f32 %v629_v34, %v533_v2  ;;  %v630_v37 = vmul.f32 %v613_v31, %v516_v33 }
 0x205   :  { %v643_v61 = vadd.f32 %v627_v58, %v531_v50  ;;  %v628_v41 = vmul.f32 %v603_v55, %v508_v54 }
 0x206   :  { %661 = vst.msk [vmem:[#allocation2 + $0x70] sm:$0xff] %vm31_vm0, %v645_v57  ;;  %v646_v48 = vadd.f32 %v630_v37, %v534_v46 }
 0x207   :  { %659 = vst.msk [vmem:[#allocation2 + $0x60] sm:$0xff] %vm31_vm0, %v643_v61  ;;  %v644_v43 = vadd.f32 %v628_v41, %v532_v49 }
 0x208   :  { %662 = vst.msk [vmem:[#allocation2 + $0x78] sm:$0xff] %vm31_vm0, %v646_v48 }
 0x209   :  { %660 = vst.msk [vmem:[#allocation2 + $0x68] sm:$0xff] %vm31_vm0, %v644_v43 }
 0x20a PF:  { %s2493_s11 = sld [smem:[#allocation4 + $0x1]] }
 0x210   :  { %p2494_p6 = scmp.eq.s32.totalorder %s2493_s11, 0 }
 0x211   :  { %v2949_v47 = vld [vmem:[%s3917_s3 + $0x10] sm:$0xff] (!%p2494_p6)   ;;  %v2501_v53 = vcombine.low (!%p2494_p6), %v3133_v0, %v3138_v1  ;;  %v2950_v52 = vld [vmem:[%s3917_s3 + $0x18] sm:$0xff] (!%p2494_p6)   ;;  %v2502_v36 = vcombine.low (!%p2494_p6), %v3159_v3, %v3164_v4  ;;  %v2503_v40 = vcombine.low (!%p2494_p6), %v3169_v5, %v3174_v6  ;;  %v2504_v63 = vcombine.low (!%p2494_p6), %v3179_v7, %v3184_v8  ;;  %v2951_v42 = vld [vmem:[%s3919_s5 + $0x20] sm:$0xff] (!%p2494_p6)  }
 0x212   :  { %668 = sbr.rel (%p2494_p6) target bundleno = 1021 (0x3fd), region = 33  ;;  %2769 = vmatprep.subr.bf16.mxu0 (!%p2494_p6), %v2949_v47  ;;  %v2505_v55 = vcombine.low (!%p2494_p6), %v3189_v9, %v3194_v10  ;;  %v2506_v39 = vcombine.low (!%p2494_p6), %v3199_v11, %v3204_v12  ;;  %v2507_v44 = vcombine.low (!%p2494_p6), %v3209_v13, %v3214_v14  ;;  %v2508_v45 = vcombine.low (!%p2494_p6), %v3219_v15, %v3224_v16  ;;  %v2952_v62 = vld [vmem:[%s3919_s5 + $0x28] sm:$0xff] (!%p2494_p6)   ;;  %v2953_v59 = vld [vmem:[%s3919_s5 + $0x30] sm:$0xff] (!%p2494_p6)   ;;  %v2954_v35 = vld [vmem:[%s3919_s5 + $0x38] sm:$0xff] (!%p2494_p6)  }
 0x213   :  { %2773 = vmatprep.mubr.msk.bf16.mxu0 (!%p2494_p6), %vm31_vm0, %v2501_v53  ;;  %2770 = vmatpush3.bf16.msra.mxu0 (!%p2494_p6), %v2949_v47  ;;  %v3084_v60 = vmov (!%p2494_p6), 1   ;;  %v3924_v2 = vld [vmem:[#allocation6_spill] sm:$0xff] (!%p2494_p6)  ;;  %vm984_vm2 = vcmask (!%p2494_p6), 523264  }
 0x214   :  { %2771 = vmatprep.subr.bf16.mxu0 (!%p2494_p6), %v2950_v52  ;;  %2789 = vmatprep.subr.bf16.mxu1 (!%p2494_p6), %v2951_v42  ;;  %v3503_v38 = vld [vmem:[%s3918_s4 + $0x1] ss:$0 sm:$0xff] (!%p2494_p6) }
 0x215   :  { %2790 = vmatpush3.bf16.msra.mxu1 (!%p2494_p6), %v2951_v42  ;;  %2948 = vset.pattern.permute.xlu1 (!%p2494_p6), %v3084_v60 }
 0x216   :  { %2791 = vmatprep.subr.bf16.mxu1 (!%p2494_p6), %v2952_v62  ;;  %2947 = vset.pattern.permute.xlu0 (!%p2494_p6), %v3084_v60 }
 0x217   :  { %2772 = vmatpush3.bf16.msra.mxu0 (!%p2494_p6), %v2950_v52  ;;  %1134 = vperm.xlu1 (!%p2494_p6), %2948, %v3239_v19  }
 0x218   :  { %1124 = vperm.xlu0 (!%p2494_p6), %2947, %v3229_v17  }
 0x219   :  { %2792 = vmatpush3.bf16.msra.mxu1 %v2952_v62 }
 0x21a   :  { %2774 = vmatmul.mubr.msk.bf16.vlgmr.msra.gmra.mrb[0].mxu0 %vm31_vm0, %v2502_v36  ;;  %2793 = vmatprep.subr.bf16.mxu1 %v2953_v59 }
 0x21b   :  { %2777 = vmatprep.mubr.msk.bf16.mxu0 %vm31_vm0, %v2503_v40  ;;  %1139 = vperm.xlu1 %2948, %v3244_v20  }
 0x21c   :  { %1129 = vperm.xlu0 %2947, %v3234_v18  }
 0x21d   :  { %2794 = vmatpush3.bf16.msra.mxu1 %v2953_v59 }
 0x21e   :  { %2795 = vmatprep.subr.bf16.mxu1 %v2954_v35 }
 0x21f   :  { %1149 = vperm.xlu1 %2948, %v3254_v22  }
 0x220   :  { %1144 = vperm.xlu0 %2947, %v3249_v21  }
 0x221   :  { %2796 = vmatpush3.bf16.msra.mxu1 %v2954_v35 }
 0x222   :  { %2778 = vmatmul.mubr.msk.bf16.gmra.mrb[4].mxu0 %vm31_vm0, %v2504_v63 }
 0x223   :  { %2781 = vmatprep.mubr.msk.bf16.mxu0 %vm31_vm0, %v2505_v55  ;;  %1159 = vperm.xlu1 %2948, %v3264_v24  }
 0x224   :  { %1154 = vperm.xlu0 %2947, %v3259_v23  }
 0x227   :  { %1169 = vperm.xlu1 %2948, %v3274_v26  }
 0x228   :  { %1164 = vperm.xlu0 %2947, %v3269_v25  }
 0x22a   :  { %2782 = vmatmul.mubr.msk.bf16.gmra.mrb[8].mxu0 %vm31_vm0, %v2506_v39 }
 0x22b   :  { %2785 = vmatprep.mubr.msk.bf16.mxu0 %vm31_vm0, %v2507_v44  ;;  %1179 = vperm.xlu1 %2948, %v3284_v28  }
 0x22c   :  { %1174 = vperm.xlu0 %2947, %v3279_v27  }
 0x22f   :  { %1189 = vperm.xlu1 %2948, %v3294_v30  }
 0x230   :  { %1184 = vperm.xlu0 %2947, %v3289_v29  }
 0x232   :  { %2786 = vmatmul.mubr.msk.bf16.gmra.mrb[12].mxu0 %vm31_vm0, %v2508_v45 }
 0x233   :  { %1199 = vperm.xlu1 %2948, %v3304_v32  }
 0x234   :  { %1194 = vperm.xlu0 %2947, %v3924_v2  }
 0x2ed   :  { %v2775_v56 = vpop.f32.mrb[0].mxu0 }
 0x2ee   :  { %v801_v34 = vadd.f32 %v2775_v56, %v3503_v38  ;;  %v792_v50 = vpop.f32.mrb[1].mxu0 }
 0x2ef   :  { %v793_v33 = vadd.f32 %v3503_v38, %v792_v50  ;;  %v2776_v51 = vpop.f32.mrb[2].mxu0 }
 0x2f0   :  { %v873_v31 = vmul.f32 0.70710677, %v801_v34  ;;  %v804_v58 = vadd.f32 %v2776_v51, %v3503_v38  ;;  %v795_v46 = vpop.f32.mrb[3].mxu0  ;;  %v857_v56 = vmul.f32 0.5, %v801_v34 }
 0x2f1   :  { %v871_v54 = vmul.f32 0.70710677, %v793_v33  ;;  %v796_v57 = vadd.f32 %v3503_v38, %v795_v46 }
 0x2f2   :  { %2955 = verf.f32 %v873_v31  ;;  %v874_v37 = vmul.f32 0.70710677, %v804_v58  ;;  %v858_v50 = vmul.f32 0.5, %v804_v58  ;;  %v855_v58 = vmul.f32 0.5, %v793_v33 }
 0x2f3   :  { %2957 = verf.f32 %v871_v54  ;;  %v872_v49 = vmul.f32 0.70710677, %v796_v57 }
 0x2f4   :  { %2959 = verf.f32 %v874_v37 }
 0x2f5   :  { %2961 = verf.f32 %v872_v49  ;;  %v2779_v61 = vpop.f32.mrb[4].mxu0 }
 0x2f6   :  { %v817_v41 = vadd.f32 %v2779_v61, %v3503_v38  ;;  %v808_v48 = vpop.f32.mrb[5].mxu0 }
 0x2f7   :  { %v809_v43 = vadd.f32 %v3503_v38, %v808_v48  ;;  %v2780_v47 = vpop.f32.mrb[6].mxu0 }
 0x2f8   :  { %v877_v53 = vmul.f32 0.70710677, %v817_v41  ;;  %v820_v52 = vadd.f32 %v2780_v47, %v3503_v38  ;;  %v811_v36 = vpop.f32.mrb[7].mxu0 }
 0x2f9   :  { %v875_v40 = vmul.f32 0.70710677, %v809_v43  ;;  %v812_v63 = vadd.f32 %v3503_v38, %v811_v36 }
 0x2fa   :  { %2963 = verf.f32 %v877_v53  ;;  %v878_v55 = vmul.f32 0.70710677, %v820_v52 }
 0x2fb   :  { %2965 = verf.f32 %v875_v40  ;;  %v876_v39 = vmul.f32 0.70710677, %v812_v63  ;;  %v856_v40 = vmul.f32 0.5, %v796_v57 }
 0x2fc   :  { %v2956_v44 = vpop.eup %2955  ;;  %2967 = verf.f32 %v878_v55 }
 0x2fd   :  { %v2958_v45 = vpop.eup %2957  ;;  %v905_v42 = vadd.f32 1.0, %v2956_v44  ;;  %2969 = verf.f32 %v876_v39  ;;  %v2783_v62 = vpop.f32.mrb[8].mxu0 }
 0x2fe   :  { %v2960_v59 = vpop.eup %2959  ;;  %v3514_v35 = vadd.f32 %v2783_v62, %v3503_v38  ;;  %v824_v60 = vpop.f32.mrb[9].mxu0  ;;  %v903_v61 = vadd.f32 1.0, %v2958_v45 }
 0x2ff   :  { %v2962_v2 = vpop.eup %2961  ;;  %v906_v51 = vadd.f32 1.0, %v2960_v59  ;;  %v3517_v31 = vadd.f32 %v3503_v38, %v824_v60  ;;  %v2784_v46 = vpop.f32.mrb[10].mxu0  ;;  %v921_v47 = vmul.f32 %v905_v42, %v857_v56 }
 0x300   :  { %v881_v54 = vmul.f32 0.70710677, %v3514_v35  ;;  %v3521_v37 = vadd.f32 %v2784_v46, %v3503_v38  ;;  %v827_v49 = vpop.f32.mrb[11].mxu0  ;;  %v904_v48 = vadd.f32 1.0, %v2962_v2  ;;  %v919_v59 = vmul.f32 %v903_v61, %v855_v58 }
 0x301   :  { %v922_v53 = vmul.f32 %v906_v51, %v858_v50  ;;  %v879_v36 = vmul.f32 0.70710677, %v3517_v31  ;;  %v828_v34 = vadd.f32 %v3503_v38, %v827_v49  ;;  %v862_v49 = vmul.f32 0.5, %v820_v52 }
 0x302   :  { %2971 = verf.f32 %v881_v54  ;;  %v882_v55 = vmul.f32 0.70710677, %v3521_v37  ;;  %v920_v60 = vmul.f32 %v904_v48, %v856_v40  ;;  %v861_v54 = vmul.f32 0.5, %v817_v41 }
 0x303   :  { %v936_v39 = vpack.c.bf16 %v922_v53, %v921_v47  ;;  %2973 = verf.f32 %v879_v36  ;;  %v880_v44 = vmul.f32 0.70710677, %v828_v34  ;;  %v859_v61 = vmul.f32 0.5, %v809_v43 }
 0x304   :  { %v2964_v62 = vpop.eup %2963  ;;  %2975 = verf.f32 %v882_v55  ;;  %v935_v51 = vpack.c.bf16 %v920_v60, %v919_v59  ;;  %v860_v48 = vmul.f32 0.5, %v812_v63 }
 0x305   :  { %v2966_v45 = vpop.eup %2965  ;;  %v909_v2 = vadd.f32 1.0, %v2964_v62  ;;  %2977 = verf.f32 %v880_v44  ;;  %v2787_v42 = vpop.f32.mrb[12].mxu0 }
 0x306   :  { %v2968_v56 = vpop.eup %2967  ;;  %v907_v50 = vadd.f32 1.0, %v2966_v45  ;;  %v849_v33 = vadd.f32 %v2787_v42, %v3503_v38  ;;  %v840_v57 = vpop.f32.mrb[13].mxu0  ;;  %2797 = vmatprep.mubr.msk.bf16.mxu1 %vm984_vm2, %v935_v51 }
 0x307   :  { %v2970_v46 = vpop.eup %2969  ;;  %v910_v47 = vadd.f32 1.0, %v2968_v56  ;;  %v841_v53 = vadd.f32 %v3503_v38, %v840_v57  ;;  %v2788_v36 = vpop.f32.mrb[14].mxu0  ;;  %v925_v44 = vmul.f32 %v909_v2, %v861_v54  ;;  %2798 = vmatmul.mubr.msk.bf16.vlgmr.msra.gmra.mrb[0].mxu1 %vm984_vm2, %v936_v39 }
 0x308   :  { %v908_v58 = vadd.f32 1.0, %v2970_v46  ;;  %v885_v40 = vmul.f32 0.70710677, %v849_v33  ;;  %v843_v55 = vpop.f32.mrb[15].mxu0  ;;  %v852_v42 = vadd.f32 %v2788_v36, %v3503_v38  ;;  %v923_v41 = vmul.f32 %v907_v50, %v859_v61 }
 0x309   :  { %v926_v62 = vmul.f32 %v910_v47, %v862_v49  ;;  %v883_v45 = vmul.f32 0.70710677, %v841_v53  ;;  %v844_v59 = vadd.f32 %v3503_v38, %v843_v55  ;;  %v865_v50 = vmul.f32 0.5, %v3514_v35 }
 0x30a   :  { %v924_v52 = vmul.f32 %v908_v58, %v860_v48  ;;  %2979 = verf.f32 %v885_v40  ;;  %v886_v43 = vmul.f32 0.70710677, %v852_v42  ;;  %v866_v49 = vmul.f32 0.5, %v3521_v37 }
 0x30b   :  { %v938_v60 = vpack.c.bf16 %v926_v62, %v925_v44  ;;  %2981 = verf.f32 %v883_v45  ;;  %v884_v57 = vmul.f32 0.70710677, %v844_v59  ;;  %v863_v47 = vmul.f32 0.5, %v3517_v31 }
 0x30c   :  { %v2972_v63 = vpop.eup %2971  ;;  %v937_v56 = vpack.c.bf16 %v924_v52, %v923_v41  ;;  %2983 = verf.f32 %v886_v43  ;;  %v864_v36 = vmul.f32 0.5, %v828_v34  ;;  %v870_v31 = vmul.f32 0.5, %v852_v42 }
 0x30d   :  { %v2974_v51 = vpop.eup %2973  ;;  %v913_v46 = vadd.f32 1.0, %v2972_v63  ;;  %2985 = verf.f32 %v884_v57  ;;  %v869_v63 = vmul.f32 0.5, %v849_v33  ;;  %v868_v57 = vmul.f32 0.5, %v844_v59  ;;  %v3544_v59 = vld [vmem:[%s3920_s6 + $0x1] ss:$0 sm:$0xff] }
 0x30e   :  { %v2976_v2 = vpop.eup %2975  ;;  %v911_v54 = vadd.f32 1.0, %v2974_v51  ;;  %2801 = vmatprep.mubr.msk.bf16.mxu1 %vm984_vm2, %v937_v56  ;;  %v867_v56 = vmul.f32 0.5, %v841_v53 }
 0x30f   :  { %v2978_v39 = vpop.eup %2977  ;;  %v914_v38 = vadd.f32 1.0, %v2976_v2  ;;  %v929_v48 = vmul.f32 %v913_v46, %v865_v50  ;;  %2802 = vmatmul.mubr.msk.bf16.gmra.mrb[4].mxu1 %vm984_vm2, %v938_v60 }
 0x310   :  { %v912_v61 = vadd.f32 1.0, %v2978_v39  ;;  %v927_v40 = vmul.f32 %v911_v54, %v863_v47 }
 0x311   :  { %v930_v58 = vmul.f32 %v914_v38, %v866_v49  ;;  %v1125_v49 = vpop.permute.xlu0 %1124  ;;  %v1135_v38 = vpop.permute.xlu1 %1134 }
 0x312   :  { %v928_v55 = vmul.f32 %v912_v61, %v864_v36 }
 0x313   :  { %v940_v44 = vpack.c.bf16 %v930_v58, %v929_v48 }
 0x314   :  { %v2980_v62 = vpop.eup %2979  ;;  %v939_v45 = vpack.c.bf16 %v928_v55, %v927_v40  ;;  %v1108_v40 = vld [vmem:[#allocation2 + $0x10] sm:$0xff] }
 0x315   :  { %v2982_v41 = vpop.eup %2981  ;;  %v917_v52 = vadd.f32 1.0, %v2980_v62  ;;  %v1130_v33 = vpop.permute.xlu0 %1129 }
 0x316   :  { %2805 = vmatprep.mubr.msk.bf16.mxu1 %vm984_vm2, %v939_v45  ;;  %v2984_v35 = vpop.eup %2983  ;;  %v915_v37 = vadd.f32 1.0, %v2982_v41  ;;  %v1140_v42 = vpop.permute.xlu1 %1139  ;;  %v1106_v45 = vld [vmem:[#allocation2] sm:$0xff] }
 0x317   :  { %v2986_v43 = vpop.eup %2985  ;;  %v918_v34 = vadd.f32 1.0, %v2984_v35  ;;  %2806 = vmatmul.mubr.msk.bf16.gmra.mrb[8].mxu1 %vm984_vm2, %v940_v44  ;;  %v933_v60 = vmul.f32 %v917_v52, %v869_v63 }
 0x318   :  { %v916_v51 = vadd.f32 1.0, %v2986_v43  ;;  %v931_v2 = vmul.f32 %v915_v37, %v867_v56  ;;  %v1109_v43 = vld [vmem:[#allocation2 + $0x18] sm:$0xff]  ;;  %v1107_v56 = vld [vmem:[#allocation2 + $0x8] sm:$0xff] }
 0x319   :  { %v934_v46 = vmul.f32 %v918_v34, %v870_v31  ;;  %v1145_v47 = vpop.permute.xlu0 %1144 }
 0x31a   :  { %v932_v54 = vmul.f32 %v916_v51, %v868_v57  ;;  %v1150_v53 = vpop.permute.xlu1 %1149 }
 0x31b   :  { %v942_v39 = vpack.c.bf16 %v934_v46, %v933_v60 }
 0x31c   :  { %v941_v50 = vpack.c.bf16 %v932_v54, %v931_v2 }
 0x31d   :  { %v1155_v58 = vpop.permute.xlu0 %1154 }
 0x31e   :  { %2809 = vmatprep.mubr.msk.bf16.mxu1 %vm984_vm2, %v941_v50  ;;  %v1160_v35 = vpop.permute.xlu1 %1159 }
 0x31f   :  { %2810 = vmatmul.mubr.msk.bf16.gmra.mrb[12].mxu1 %vm984_vm2, %v942_v39 }
 0x321   :  { %v1165_v46 = vpop.permute.xlu0 %1164 }
 0x3da   :  { %v2799_v36 = vpop.f32.mrb[0].mxu1 }
 0x3db   :  { %v1052_v61 = vadd.f32 %v2799_v36, %v3544_v59  ;;  %v1043_v48 = vpop.f32.mrb[1].mxu1 }
 0x3dc   :  { %v1044_v55 = vadd.f32 %v3544_v59, %v1043_v48  ;;  %v2800_v44 = vpop.f32.mrb[2].mxu1 }
 0x3dd   :  { %v1204_v62 = vmul.f32 %v1135_v38, %v1052_v61  ;;  %v1055_v41 = vadd.f32 %v2800_v44, %v3544_v59  ;;  %v1046_v52 = vpop.f32.mrb[3].mxu1  ;;  %v1112_v38 = vld [vmem:[#allocation2 + $0x30] sm:$0xff]  ;;  %v1110_v61 = vld [vmem:[#allocation2 + $0x20] sm:$0xff]  ;;  %v1113_v44 = vld [vmem:[#allocation2 + $0x38] sm:$0xff] }
 0x3de   :  { %v1202_v37 = vmul.f32 %v1125_v49, %v1044_v55  ;;  %v1047_v63 = vadd.f32 %v3544_v59, %v1046_v52  ;;  %v1170_v49 = vpop.permute.xlu1 %1169  ;;  %v1111_v52 = vld [vmem:[#allocation2 + $0x28] sm:$0xff] }
 0x3df   :  { %v1220_v31 = vadd.f32 %v1204_v62, %v1108_v40  ;;  %v1205_v34 = vmul.f32 %v1140_v42, %v1055_v41 }
 0x3e0   :  { %v1218_v57 = vadd.f32 %v1202_v37, %v1106_v45  ;;  %v1203_v51 = vmul.f32 %v1130_v33, %v1047_v63  ;;  %v1175_v37 = vpop.permute.xlu0 %1174 }
 0x3e1   :  { %1236 = vst.msk [vmem:[#allocation2 + $0x10] sm:$0xff] %vm31_vm0, %v1220_v31  ;;  %v1221_v60 = vadd.f32 %v1205_v34, %v1109_v43 }
 0x3e2   :  { %1234 = vst.msk [vmem:[#allocation2] sm:$0xff] %vm31_vm0, %v1218_v57  ;;  %v1219_v2 = vadd.f32 %v1203_v51, %v1107_v56  ;;  %v2803_v54 = vpop.f32.mrb[4].mxu1  ;;  %v1180_v34 = vpop.permute.xlu1 %1179 }
 0x3e3   :  { %1237 = vst.msk [vmem:[#allocation2 + $0x18] sm:$0xff] %vm31_vm0, %v1221_v60  ;;  %v1068_v39 = vadd.f32 %v2803_v54, %v3544_v59  ;;  %v1059_v50 = vpop.f32.mrb[5].mxu1 }
 0x3e4   :  { %1235 = vst.msk [vmem:[#allocation2 + $0x8] sm:$0xff] %vm31_vm0, %v1219_v2  ;;  %v1060_v42 = vadd.f32 %v3544_v59, %v1059_v50  ;;  %v2804_v33 = vpop.f32.mrb[6].mxu1  ;;  %v1114_v2 = vld [vmem:[#allocation2 + $0x40] sm:$0xff]  ;;  %v1185_v50 = vpop.permute.xlu0 %1184 }
 0x3e5   :  { %v1208_v36 = vmul.f32 %v1155_v58, %v1068_v39  ;;  %v1071_v48 = vadd.f32 %v2804_v33, %v3544_v59  ;;  %v1062_v40 = vpop.f32.mrb[7].mxu1 }
 0x3e6   :  { %v1206_v55 = vmul.f32 %v1145_v47, %v1060_v42  ;;  %v1063_v62 = vadd.f32 %v3544_v59, %v1062_v40  ;;  %v1117_v42 = vld [vmem:[#allocation2 + $0x58] sm:$0xff]  ;;  %v1190_v40 = vpop.permute.xlu1 %1189 }
 0x3e7   :  { %v1224_v45 = vadd.f32 %v1208_v36, %v1112_v38  ;;  %v1209_v41 = vmul.f32 %v1160_v35, %v1071_v48  ;;  %v1116_v35 = vld [vmem:[#allocation2 + $0x50] sm:$0xff]  ;;  %v1115_v48 = vld [vmem:[#allocation2 + $0x48] sm:$0xff] }
 0x3e8   :  { %v1222_v43 = vadd.f32 %v1206_v55, %v1110_v61  ;;  %v1207_v63 = vmul.f32 %v1150_v53, %v1063_v62 }
 0x3e9   :  { %1240 = vst.msk [vmem:[#allocation2 + $0x30] sm:$0xff] %vm31_vm0, %v1224_v45  ;;  %v1225_v31 = vadd.f32 %v1209_v41, %v1113_v44 }
 0x3ea   :  { %1238 = vst.msk [vmem:[#allocation2 + $0x20] sm:$0xff] %vm31_vm0, %v1222_v43  ;;  %v1223_v58 = vadd.f32 %v1207_v63, %v1111_v52  ;;  %v2807_v56 = vpop.f32.mrb[8].mxu1  ;;  %v1120_v43 = vld [vmem:[#allocation2 + $0x70] sm:$0xff] }
 0x3eb   :  { %1241 = vst.msk [vmem:[#allocation2 + $0x38] sm:$0xff] %vm31_vm0, %v1225_v31  ;;  %v1084_v47 = vadd.f32 %v2807_v56, %v3544_v59  ;;  %v1075_v57 = vpop.f32.mrb[9].mxu1 }
 0x3ec   :  { %1239 = vst.msk [vmem:[#allocation2 + $0x28] sm:$0xff] %vm31_vm0, %v1223_v58  ;;  %v1076_v51 = vadd.f32 %v3544_v59, %v1075_v57  ;;  %v2808_v60 = vpop.f32.mrb[10].mxu1 }
 0x3ed   :  { %v1212_v53 = vmul.f32 %v1175_v37, %v1084_v47  ;;  %v1087_v54 = vadd.f32 %v2808_v60, %v3544_v59  ;;  %v1078_v39 = vpop.f32.mrb[11].mxu1  ;;  %v1195_v37 = vpop.permute.xlu0 %1194 }
 0x3ee   :  { %v1210_v38 = vmul.f32 %v1165_v46, %v1076_v51  ;;  %v1079_v33 = vadd.f32 %v3544_v59, %v1078_v39  ;;  %v1200_v47 = vpop.permute.xlu1 %1199 }
 0x3ef   :  { %v1228_v36 = vadd.f32 %v1212_v53, %v1116_v35  ;;  %v1213_v61 = vmul.f32 %v1180_v34, %v1087_v54  ;;  %v1118_v34 = vld [vmem:[#allocation2 + $0x60] sm:$0xff]  ;;  %v1121_v35 = vld [vmem:[#allocation2 + $0x78] sm:$0xff] }
 0x3f0   :  { %v1226_v55 = vadd.f32 %v1210_v38, %v1114_v2  ;;  %v1211_v44 = vmul.f32 %v1170_v49, %v1079_v33  ;;  %v1119_v2 = vld [vmem:[#allocation2 + $0x68] sm:$0xff] }
 0x3f1   :  { %1244 = vst.msk [vmem:[#allocation2 + $0x50] sm:$0xff] %vm31_vm0, %v1228_v36  ;;  %v1229_v62 = vadd.f32 %v1213_v61, %v1117_v42 }
 0x3f2   :  { %1242 = vst.msk [vmem:[#allocation2 + $0x40] sm:$0xff] %vm31_vm0, %v1226_v55  ;;  %v1227_v45 = vadd.f32 %v1211_v44, %v1115_v48  ;;  %v2811_v41 = vpop.f32.mrb[12].mxu1 }
 0x3f3   :  { %1245 = vst.msk [vmem:[#allocation2 + $0x58] sm:$0xff] %vm31_vm0, %v1229_v62  ;;  %v1100_v46 = vadd.f32 %v2811_v41, %v3544_v59  ;;  %v1091_v52 = vpop.f32.mrb[13].mxu1 }
 0x3f4   :  { %1243 = vst.msk [vmem:[#allocation2 + $0x48] sm:$0xff] %vm31_vm0, %v1227_v45  ;;  %v1092_v63 = vadd.f32 %v3544_v59, %v1091_v52  ;;  %v2812_v31 = vpop.f32.mrb[14].mxu1 }
 0x3f5   :  { %v1216_v49 = vmul.f32 %v1195_v37, %v1100_v46  ;;  %v1103_v58 = vadd.f32 %v2812_v31, %v3544_v59  ;;  %v1094_v56 = vpop.f32.mrb[15].mxu1 }
 0x3f6   :  { %v1214_v57 = vmul.f32 %v1185_v50, %v1092_v63  ;;  %v1095_v51 = vadd.f32 %v3544_v59, %v1094_v56 }
 0x3f7   :  { %v1232_v60 = vadd.f32 %v1216_v49, %v1120_v43  ;;  %v1217_v53 = vmul.f32 %v1200_v47, %v1103_v58 }
 0x3f8   :  { %v1230_v54 = vadd.f32 %v1214_v57, %v1118_v34  ;;  %v1215_v39 = vmul.f32 %v1190_v40, %v1095_v51 }
 0x3f9   :  { %1248 = vst.msk [vmem:[#allocation2 + $0x70] sm:$0xff] %vm31_vm0, %v1232_v60  ;;  %v1233_v38 = vadd.f32 %v1217_v53, %v1121_v35 }
 0x3fa   :  { %1246 = vst.msk [vmem:[#allocation2 + $0x60] sm:$0xff] %vm31_vm0, %v1230_v54  ;;  %v1231_v42 = vadd.f32 %v1215_v39, %v1119_v2 }
 0x3fb   :  { %1249 = vst.msk [vmem:[#allocation2 + $0x78] sm:$0xff] %vm31_vm0, %v1233_v38 }
 0x3fc   :  { %1247 = vst.msk [vmem:[#allocation2 + $0x68] sm:$0xff] %vm31_vm0, %v1231_v42 }
 0x3fd PF:  { %s2541_s26 = sld [smem:[#allocation4 + $0x2]] }
 0x403   :  { %p2542_p7 = scmp.eq.s32.totalorder %s2541_s26, 0 }
 0x404   :  { %v2989_v59 = vld [vmem:[%s3917_s3 + $0x20] sm:$0xff] (!%p2542_p7)   ;;  %v2549_v50 = vcombine.low (!%p2542_p7), %v3133_v0, %v3138_v1  ;;  %v2990_v33 = vld [vmem:[%s3917_s3 + $0x28] sm:$0xff] (!%p2542_p7)   ;;  %v2550_v36 = vcombine.low (!%p2542_p7), %v3159_v3, %v3164_v4  ;;  %v2551_v61 = vcombine.low (!%p2542_p7), %v3169_v5, %v3174_v6  ;;  %v2552_v48 = vcombine.low (!%p2542_p7), %v3179_v7, %v3184_v8  ;;  %v2993_v46 = vld [vmem:[%s3919_s5 + $0x50] sm:$0xff] (!%p2542_p7)  }
 0x405   :  { %1255 = sbr.rel (%p2542_p7) target bundleno = 1520 (0x5f0), region = 37  ;;  %2813 = vmatprep.subr.bf16.mxu0 (!%p2542_p7), %v2989_v59  ;;  %v2553_v40 = vcombine.low (!%p2542_p7), %v3189_v9, %v3194_v10  ;;  %v2554_v55 = vcombine.low (!%p2542_p7), %v3199_v11, %v3204_v12  ;;  %v2555_v44 = vcombine.low (!%p2542_p7), %v3209_v13, %v3214_v14  ;;  %v2556_v62 = vcombine.low (!%p2542_p7), %v3219_v15, %v3224_v16  ;;  %v2991_v45 = vld [vmem:[%s3919_s5 + $0x40] sm:$0xff] (!%p2542_p7)   ;;  %v2992_v41 = vld [vmem:[%s3919_s5 + $0x48] sm:$0xff] (!%p2542_p7)   ;;  %v2994_v52 = vld [vmem:[%s3919_s5 + $0x58] sm:$0xff] (!%p2542_p7)  }
 0x406   :  { %2817 = vmatprep.mubr.msk.bf16.mxu0 (!%p2542_p7), %vm31_vm0, %v2549_v50  ;;  %2814 = vmatpush3.bf16.msra.mxu0 (!%p2542_p7), %v2989_v59  ;;  %v3085_v37 = vmov (!%p2542_p7), 2   ;;  %v3925_v43 = vld [vmem:[#allocation6_spill] sm:$0xff] (!%p2542_p7)  ;;  %vm1571_vm3 = vcmask (!%p2542_p7), 523264  }
 0x407   :  { %2815 = vmatprep.subr.bf16.mxu0 (!%p2542_p7), %v2990_v33  ;;  %2833 = vmatprep.subr.bf16.mxu1 (!%p2542_p7), %v2991_v45  ;;  %v3639_v63 = vld [vmem:[%s3918_s4 + $0x2] ss:$0 sm:$0xff] (!%p2542_p7) }
 0x408   :  { %2834 = vmatpush3.bf16.msra.mxu1 (!%p2542_p7), %v2991_v45  ;;  %2988 = vset.pattern.permute.xlu1 (!%p2542_p7), %v3085_v37 }
 0x409   :  { %2835 = vmatprep.subr.bf16.mxu1 (!%p2542_p7), %v2992_v41  ;;  %2987 = vset.pattern.permute.xlu0 (!%p2542_p7), %v3085_v37 }
 0x40a   :  { %2816 = vmatpush3.bf16.msra.mxu0 (!%p2542_p7), %v2990_v33  ;;  %1721 = vperm.xlu1 (!%p2542_p7), %2988, %v3239_v19  }
 0x40b   :  { %1711 = vperm.xlu0 (!%p2542_p7), %2987, %v3229_v17  }
 0x40c   :  { %2836 = vmatpush3.bf16.msra.mxu1 %v2992_v41 }
 0x40d   :  { %2818 = vmatmul.mubr.msk.bf16.vlgmr.msra.gmra.mrb[0].mxu0 %vm31_vm0, %v2550_v36  ;;  %2837 = vmatprep.subr.bf16.mxu1 %v2993_v46 }
 0x40e   :  { %2821 = vmatprep.mubr.msk.bf16.mxu0 %vm31_vm0, %v2551_v61  ;;  %1726 = vperm.xlu1 %2988, %v3244_v20  }
 0x40f   :  { %1716 = vperm.xlu0 %2987, %v3234_v18  }
 0x410   :  { %2838 = vmatpush3.bf16.msra.mxu1 %v2993_v46 }
 0x411   :  { %2839 = vmatprep.subr.bf16.mxu1 %v2994_v52 }
 0x412   :  { %1736 = vperm.xlu1 %2988, %v3254_v22  }
 0x413   :  { %1731 = vperm.xlu0 %2987, %v3249_v21  }
 0x414   :  { %2840 = vmatpush3.bf16.msra.mxu1 %v2994_v52 }
 0x415   :  { %2822 = vmatmul.mubr.msk.bf16.gmra.mrb[4].mxu0 %vm31_vm0, %v2552_v48 }
 0x416   :  { %2825 = vmatprep.mubr.msk.bf16.mxu0 %vm31_vm0, %v2553_v40  ;;  %1746 = vperm.xlu1 %2988, %v3264_v24  }
 0x417   :  { %1741 = vperm.xlu0 %2987, %v3259_v23  }
 0x41a   :  { %1756 = vperm.xlu1 %2988, %v3274_v26  }
 0x41b   :  { %1751 = vperm.xlu0 %2987, %v3269_v25  }
 0x41d   :  { %2826 = vmatmul.mubr.msk.bf16.gmra.mrb[8].mxu0 %vm31_vm0, %v2554_v55 }
 0x41e   :  { %2829 = vmatprep.mubr.msk.bf16.mxu0 %vm31_vm0, %v2555_v44  ;;  %1766 = vperm.xlu1 %2988, %v3284_v28  }
 0x41f   :  { %1761 = vperm.xlu0 %2987, %v3279_v27  }
 0x422   :  { %1776 = vperm.xlu1 %2988, %v3294_v30  }
 0x423   :  { %1771 = vperm.xlu0 %2987, %v3289_v29  }
 0x425   :  { %2830 = vmatmul.mubr.msk.bf16.gmra.mrb[12].mxu0 %vm31_vm0, %v2556_v62 }
 0x426   :  { %1786 = vperm.xlu1 %2988, %v3304_v32  }
 0x427   :  { %1781 = vperm.xlu0 %2987, %v3925_v43  }
 0x4e0   :  { %v2819_v31 = vpop.f32.mrb[0].mxu0 }
 0x4e1   :  { %v1388_v49 = vadd.f32 %v2819_v31, %v3639_v63  ;;  %v1379_v34 = vpop.f32.mrb[1].mxu0 }
 0x4e2   :  { %v1380_v58 = vadd.f32 %v3639_v63, %v1379_v34  ;;  %v2820_v56 = vpop.f32.mrb[2].mxu0 }
 0x4e3   :  { %v1460_v47 = vmul.f32 0.70710677, %v1388_v49  ;;  %v1391_v57 = vadd.f32 %v2820_v56, %v3639_v63  ;;  %v1382_v35 = vpop.f32.mrb[3].mxu0  ;;  %v1444_v31 = vmul.f32 0.5, %v1388_v49 }
 0x4e4   :  { %v1458_v51 = vmul.f32 0.70710677, %v1380_v58  ;;  %v1383_v60 = vadd.f32 %v3639_v63, %v1382_v35 }
 0x4e5   :  { %2995 = verf.f32 %v1460_v47  ;;  %v1461_v53 = vmul.f32 0.70710677, %v1391_v57  ;;  %v1445_v34 = vmul.f32 0.5, %v1391_v57  ;;  %v1442_v57 = vmul.f32 0.5, %v1380_v58 }
 0x4e6   :  { %2997 = verf.f32 %v1458_v51  ;;  %v1459_v2 = vmul.f32 0.70710677, %v1383_v60 }
 0x4e7   :  { %2999 = verf.f32 %v1461_v53 }
 0x4e8   :  { %3001 = verf.f32 %v1459_v2  ;;  %v2823_v54 = vpop.f32.mrb[4].mxu0 }
 0x4e9   :  { %v1404_v39 = vadd.f32 %v2823_v54, %v3639_v63  ;;  %v1395_v38 = vpop.f32.mrb[5].mxu0 }
 0x4ea   :  { %v1396_v42 = vadd.f32 %v3639_v63, %v1395_v38  ;;  %v2824_v59 = vpop.f32.mrb[6].mxu0 }
 0x4eb   :  { %v1464_v50 = vmul.f32 0.70710677, %v1404_v39  ;;  %v1407_v33 = vadd.f32 %v2824_v59, %v3639_v63  ;;  %v1398_v36 = vpop.f32.mrb[7].mxu0 }
 0x4ec   :  { %v1462_v61 = vmul.f32 0.70710677, %v1396_v42  ;;  %v1399_v48 = vadd.f32 %v3639_v63, %v1398_v36 }
 0x4ed   :  { %3003 = verf.f32 %v1464_v50  ;;  %v1465_v40 = vmul.f32 0.70710677, %v1407_v33 }
 0x4ee   :  { %3005 = verf.f32 %v1462_v61  ;;  %v1463_v55 = vmul.f32 0.70710677, %v1399_v48  ;;  %v1443_v61 = vmul.f32 0.5, %v1383_v60 }
 0x4ef   :  { %v2996_v44 = vpop.eup %2995  ;;  %3007 = verf.f32 %v1465_v40 }
 0x4f0   :  { %v2998_v62 = vpop.eup %2997  ;;  %v1492_v45 = vadd.f32 1.0, %v2996_v44  ;;  %3009 = verf.f32 %v1463_v55  ;;  %v2827_v41 = vpop.f32.mrb[8].mxu0 }
 0x4f1   :  { %v3000_v46 = vpop.eup %2999  ;;  %v3650_v52 = vadd.f32 %v2827_v41, %v3639_v63  ;;  %v1411_v37 = vpop.f32.mrb[9].mxu0  ;;  %v1490_v54 = vadd.f32 1.0, %v2998_v62 }
 0x4f2   :  { %v3002_v43 = vpop.eup %3001  ;;  %v1493_v56 = vadd.f32 1.0, %v3000_v46  ;;  %v3653_v47 = vadd.f32 %v3639_v63, %v1411_v37  ;;  %v2828_v35 = vpop.f32.mrb[10].mxu0  ;;  %v1508_v59 = vmul.f32 %v1492_v45, %v1444_v31 }
 0x4f3   :  { %v1468_v51 = vmul.f32 0.70710677, %v3650_v52  ;;  %v3657_v53 = vadd.f32 %v2828_v35, %v3639_v63  ;;  %v1414_v2 = vpop.f32.mrb[11].mxu0  ;;  %v1491_v38 = vadd.f32 1.0, %v3002_v43  ;;  %v1506_v46 = vmul.f32 %v1490_v54, %v1442_v57 }
 0x4f4   :  { %v1509_v50 = vmul.f32 %v1493_v56, %v1445_v34  ;;  %v1466_v36 = vmul.f32 0.70710677, %v3653_v47  ;;  %v1415_v49 = vadd.f32 %v3639_v63, %v1414_v2  ;;  %v1449_v2 = vmul.f32 0.5, %v1407_v33 }
 0x4f5   :  { %3011 = verf.f32 %v1468_v51  ;;  %v1469_v40 = vmul.f32 0.70710677, %v3657_v53  ;;  %v1507_v37 = vmul.f32 %v1491_v38, %v1443_v61  ;;  %v1448_v51 = vmul.f32 0.5, %v1404_v39 }
 0x4f6   :  { %v1523_v55 = vpack.c.bf16 %v1509_v50, %v1508_v59  ;;  %3013 = verf.f32 %v1466_v36  ;;  %v1467_v44 = vmul.f32 0.70710677, %v1415_v49  ;;  %v1446_v54 = vmul.f32 0.5, %v1396_v42 }
 0x4f7   :  { %v3004_v41 = vpop.eup %3003  ;;  %3015 = verf.f32 %v1469_v40  ;;  %v1522_v56 = vpack.c.bf16 %v1507_v37, %v1506_v46  ;;  %v1447_v38 = vmul.f32 0.5, %v1399_v48 }
 0x4f8   :  { %v3006_v62 = vpop.eup %3005  ;;  %v1496_v43 = vadd.f32 1.0, %v3004_v41  ;;  %3017 = verf.f32 %v1467_v44  ;;  %v2831_v45 = vpop.f32.mrb[12].mxu0 }
 0x4f9   :  { %v3008_v31 = vpop.eup %3007  ;;  %v1494_v34 = vadd.f32 1.0, %v3006_v62  ;;  %v1436_v58 = vadd.f32 %v2831_v45, %v3639_v63  ;;  %v1427_v60 = vpop.f32.mrb[13].mxu0  ;;  %2841 = vmatprep.mubr.msk.bf16.mxu1 %vm1571_vm3, %v1522_v56 }
 0x4fa   :  { %v3010_v35 = vpop.eup %3009  ;;  %v1497_v59 = vadd.f32 1.0, %v3008_v31  ;;  %v1428_v50 = vadd.f32 %v3639_v63, %v1427_v60  ;;  %v2832_v36 = vpop.f32.mrb[14].mxu0  ;;  %v1512_v44 = vmul.f32 %v1496_v43, %v1448_v51  ;;  %2842 = vmatmul.mubr.msk.bf16.vlgmr.msra.gmra.mrb[0].mxu1 %vm1571_vm3, %v1523_v55 }
 0x4fb   :  { %v1495_v57 = vadd.f32 1.0, %v3010_v35  ;;  %v1472_v61 = vmul.f32 0.70710677, %v1436_v58  ;;  %v1430_v40 = vpop.f32.mrb[15].mxu0  ;;  %v1439_v45 = vadd.f32 %v2832_v36, %v3639_v63  ;;  %v1510_v39 = vmul.f32 %v1494_v34, %v1446_v54 }
 0x4fc   :  { %v1513_v41 = vmul.f32 %v1497_v59, %v1449_v2  ;;  %v1470_v62 = vmul.f32 0.70710677, %v1428_v50  ;;  %v1431_v46 = vadd.f32 %v3639_v63, %v1430_v40  ;;  %v1452_v34 = vmul.f32 0.5, %v3650_v52 }
 0x4fd   :  { %v1511_v33 = vmul.f32 %v1495_v57, %v1447_v38  ;;  %3019 = verf.f32 %v1472_v61  ;;  %v1473_v42 = vmul.f32 0.70710677, %v1439_v45  ;;  %v1453_v2 = vmul.f32 0.5, %v3657_v53 }
 0x4fe   :  { %v1525_v37 = vpack.c.bf16 %v1513_v41, %v1512_v44  ;;  %3021 = verf.f32 %v1470_v62  ;;  %v1471_v60 = vmul.f32 0.70710677, %v1431_v46  ;;  %v1450_v59 = vmul.f32 0.5, %v3653_v47 }
 0x4ff   :  { %v3012_v48 = vpop.eup %3011  ;;  %v1524_v31 = vpack.c.bf16 %v1511_v33, %v1510_v39  ;;  %3023 = verf.f32 %v1473_v42  ;;  %v1451_v36 = vmul.f32 0.5, %v1415_v49  ;;  %v1457_v47 = vmul.f32 0.5, %v1439_v45 }
 0x500   :  { %v3014_v56 = vpop.eup %3013  ;;  %v1500_v35 = vadd.f32 1.0, %v3012_v48  ;;  %3025 = verf.f32 %v1471_v60  ;;  %v1456_v48 = vmul.f32 0.5, %v1436_v58  ;;  %v1455_v60 = vmul.f32 0.5, %v1431_v46  ;;  %v3680_v46 = vld [vmem:[%s3920_s6 + $0x2] ss:$0 sm:$0xff] }
 0x501   :  { %v3016_v43 = vpop.eup %3015  ;;  %v1498_v51 = vadd.f32 1.0, %v3014_v56  ;;  %2845 = vmatprep.mubr.msk.bf16.mxu1 %vm1571_vm3, %v1524_v31  ;;  %v1454_v31 = vmul.f32 0.5, %v1428_v50 }
 0x502   :  { %v3018_v55 = vpop.eup %3017  ;;  %v1501_v63 = vadd.f32 1.0, %v3016_v43  ;;  %v1516_v38 = vmul.f32 %v1500_v35, %v1452_v34  ;;  %2846 = vmatmul.mubr.msk.bf16.gmra.mrb[4].mxu1 %vm1571_vm3, %v1525_v37 }
 0x503   :  { %v1499_v54 = vadd.f32 1.0, %v3018_v55  ;;  %v1514_v61 = vmul.f32 %v1498_v51, %v1450_v59 }
 0x504   :  { %v1517_v57 = vmul.f32 %v1501_v63, %v1453_v2  ;;  %v1712_v2 = vpop.permute.xlu0 %1711  ;;  %v1722_v63 = vpop.permute.xlu1 %1721 }
 0x505   :  { %v1515_v40 = vmul.f32 %v1499_v54, %v1451_v36 }
 0x506   :  { %v1527_v44 = vpack.c.bf16 %v1517_v57, %v1516_v38 }
 0x507   :  { %v3020_v41 = vpop.eup %3019  ;;  %v1526_v62 = vpack.c.bf16 %v1515_v40, %v1514_v61  ;;  %v1695_v61 = vld [vmem:[#allocation2 + $0x10] sm:$0xff] }
 0x508   :  { %v3022_v39 = vpop.eup %3021  ;;  %v1504_v33 = vadd.f32 1.0, %v3020_v41  ;;  %v1717_v58 = vpop.permute.xlu0 %1716 }
 0x509   :  { %2849 = vmatprep.mubr.msk.bf16.mxu1 %vm1571_vm3, %v1526_v62  ;;  %v3024_v52 = vpop.eup %3023  ;;  %v1502_v53 = vadd.f32 1.0, %v3022_v39  ;;  %v1727_v45 = vpop.permute.xlu1 %1726  ;;  %v1693_v62 = vld [vmem:[#allocation2] sm:$0xff] }
 0x50a   :  { %v3026_v42 = vpop.eup %3025  ;;  %v1505_v49 = vadd.f32 1.0, %v3024_v52  ;;  %2850 = vmatmul.mubr.msk.bf16.gmra.mrb[8].mxu1 %vm1571_vm3, %v1527_v44  ;;  %v1520_v37 = vmul.f32 %v1504_v33, %v1456_v48 }
 0x50b   :  { %v1503_v56 = vadd.f32 1.0, %v3026_v42  ;;  %v1518_v43 = vmul.f32 %v1502_v53, %v1454_v31  ;;  %v1696_v42 = vld [vmem:[#allocation2 + $0x18] sm:$0xff]  ;;  %v1694_v31 = vld [vmem:[#allocation2 + $0x8] sm:$0xff] }
 0x50c   :  { %v1521_v35 = vmul.f32 %v1505_v49, %v1457_v47  ;;  %v1732_v59 = vpop.permute.xlu0 %1731 }
 0x50d   :  { %v1519_v51 = vmul.f32 %v1503_v56, %v1455_v60  ;;  %v1737_v50 = vpop.permute.xlu1 %1736 }
 0x50e   :  { %v1529_v55 = vpack.c.bf16 %v1521_v35, %v1520_v37 }
 0x50f   :  { %v1528_v34 = vpack.c.bf16 %v1519_v51, %v1518_v43 }
 0x510   :  { %v1742_v57 = vpop.permute.xlu0 %1741 }
 0x511   :  { %2853 = vmatprep.mubr.msk.bf16.mxu1 %vm1571_vm3, %v1528_v34  ;;  %v1747_v52 = vpop.permute.xlu1 %1746 }
 0x512   :  { %2854 = vmatmul.mubr.msk.bf16.gmra.mrb[12].mxu1 %vm1571_vm3, %v1529_v55 }
 0x514   :  { %v1752_v35 = vpop.permute.xlu0 %1751 }
 0x5cd   :  { %v2843_v36 = vpop.f32.mrb[0].mxu1 }
 0x5ce   :  { %v1639_v54 = vadd.f32 %v2843_v36, %v3680_v46  ;;  %v1630_v38 = vpop.f32.mrb[1].mxu1 }
 0x5cf   :  { %v1631_v40 = vadd.f32 %v3680_v46, %v1630_v38  ;;  %v2844_v44 = vpop.f32.mrb[2].mxu1 }
 0x5d0   :  { %v1791_v41 = vmul.f32 %v1722_v63, %v1639_v54  ;;  %v1642_v39 = vadd.f32 %v2844_v44, %v3680_v46  ;;  %v1633_v33 = vpop.f32.mrb[3].mxu1  ;;  %v1699_v63 = vld [vmem:[#allocation2 + $0x30] sm:$0xff]  ;;  %v1697_v54 = vld [vmem:[#allocation2 + $0x20] sm:$0xff]  ;;  %v1700_v44 = vld [vmem:[#allocation2 + $0x38] sm:$0xff] }
 0x5d1   :  { %v1789_v53 = vmul.f32 %v1712_v2, %v1631_v40  ;;  %v1634_v48 = vadd.f32 %v3680_v46, %v1633_v33  ;;  %v1757_v2 = vpop.permute.xlu1 %1756  ;;  %v1698_v33 = vld [vmem:[#allocation2 + $0x28] sm:$0xff] }
 0x5d2   :  { %v1807_v47 = vadd.f32 %v1791_v41, %v1695_v61  ;;  %v1792_v49 = vmul.f32 %v1727_v45, %v1642_v39 }
 0x5d3   :  { %v1805_v60 = vadd.f32 %v1789_v53, %v1693_v62  ;;  %v1790_v56 = vmul.f32 %v1717_v58, %v1634_v48  ;;  %v1762_v53 = vpop.permute.xlu0 %1761 }
 0x5d4   :  { %1823 = vst.msk [vmem:[#allocation2 + $0x10] sm:$0xff] %vm31_vm0, %v1807_v47  ;;  %v1808_v37 = vadd.f32 %v1792_v49, %v1696_v42 }
 0x5d5   :  { %1821 = vst.msk [vmem:[#allocation2] sm:$0xff] %vm31_vm0, %v1805_v60  ;;  %v1806_v43 = vadd.f32 %v1790_v56, %v1694_v31  ;;  %v2847_v51 = vpop.f32.mrb[4].mxu1  ;;  %v1767_v49 = vpop.permute.xlu1 %1766 }
 0x5d6   :  { %1824 = vst.msk [vmem:[#allocation2 + $0x18] sm:$0xff] %vm31_vm0, %v1808_v37  ;;  %v1655_v55 = vadd.f32 %v2847_v51, %v3680_v46  ;;  %v1646_v34 = vpop.f32.mrb[5].mxu1 }
 0x5d7   :  { %1822 = vst.msk [vmem:[#allocation2 + $0x8] sm:$0xff] %vm31_vm0, %v1806_v43  ;;  %v1647_v45 = vadd.f32 %v3680_v46, %v1646_v34  ;;  %v2848_v58 = vpop.f32.mrb[6].mxu1  ;;  %v1701_v43 = vld [vmem:[#allocation2 + $0x40] sm:$0xff]  ;;  %v1772_v34 = vpop.permute.xlu0 %1771 }
 0x5d8   :  { %v1795_v36 = vmul.f32 %v1742_v57, %v1655_v55  ;;  %v1658_v38 = vadd.f32 %v2848_v58, %v3680_v46  ;;  %v1649_v61 = vpop.f32.mrb[7].mxu1 }
 0x5d9   :  { %v1793_v40 = vmul.f32 %v1732_v59, %v1647_v45  ;;  %v1650_v41 = vadd.f32 %v3680_v46, %v1649_v61  ;;  %v1704_v45 = vld [vmem:[#allocation2 + $0x58] sm:$0xff]  ;;  %v1777_v61 = vpop.permute.xlu1 %1776 }
 0x5da   :  { %v1811_v62 = vadd.f32 %v1795_v36, %v1699_v63  ;;  %v1796_v39 = vmul.f32 %v1747_v52, %v1658_v38  ;;  %v1703_v52 = vld [vmem:[#allocation2 + $0x50] sm:$0xff]  ;;  %v1702_v38 = vld [vmem:[#allocation2 + $0x48] sm:$0xff] }
 0x5db   :  { %v1809_v42 = vadd.f32 %v1793_v40, %v1697_v54  ;;  %v1794_v48 = vmul.f32 %v1737_v50, %v1650_v41 }
 0x5dc   :  { %1827 = vst.msk [vmem:[#allocation2 + $0x30] sm:$0xff] %vm31_vm0, %v1811_v62  ;;  %v1812_v47 = vadd.f32 %v1796_v39, %v1700_v44 }
 0x5dd   :  { %1825 = vst.msk [vmem:[#allocation2 + $0x20] sm:$0xff] %vm31_vm0, %v1809_v42  ;;  %v1810_v57 = vadd.f32 %v1794_v48, %v1698_v33  ;;  %v2851_v31 = vpop.f32.mrb[8].mxu1  ;;  %v1707_v42 = vld [vmem:[#allocation2 + $0x70] sm:$0xff] }
 0x5de   :  { %1828 = vst.msk [vmem:[#allocation2 + $0x38] sm:$0xff] %vm31_vm0, %v1812_v47  ;;  %v1671_v59 = vadd.f32 %v2851_v31, %v3680_v46  ;;  %v1662_v60 = vpop.f32.mrb[9].mxu1 }
 0x5df   :  { %1826 = vst.msk [vmem:[#allocation2 + $0x28] sm:$0xff] %vm31_vm0, %v1810_v57  ;;  %v1663_v56 = vadd.f32 %v3680_v46, %v1662_v60  ;;  %v2852_v37 = vpop.f32.mrb[10].mxu1 }
 0x5e0   :  { %v1799_v50 = vmul.f32 %v1762_v53, %v1671_v59  ;;  %v1674_v51 = vadd.f32 %v2852_v37, %v3680_v46  ;;  %v1665_v55 = vpop.f32.mrb[11].mxu1  ;;  %v1782_v53 = vpop.permute.xlu0 %1781 }
 0x5e1   :  { %v1797_v63 = vmul.f32 %v1752_v35, %v1663_v56  ;;  %v1666_v58 = vadd.f32 %v3680_v46, %v1665_v55  ;;  %v1787_v59 = vpop.permute.xlu1 %1786 }
 0x5e2   :  { %v1815_v36 = vadd.f32 %v1799_v50, %v1703_v52  ;;  %v1800_v54 = vmul.f32 %v1767_v49, %v1674_v51  ;;  %v1705_v49 = vld [vmem:[#allocation2 + $0x60] sm:$0xff]  ;;  %v1708_v52 = vld [vmem:[#allocation2 + $0x78] sm:$0xff] }
 0x5e3   :  { %v1813_v40 = vadd.f32 %v1797_v63, %v1701_v43  ;;  %v1798_v44 = vmul.f32 %v1757_v2, %v1666_v58  ;;  %v1706_v43 = vld [vmem:[#allocation2 + $0x68] sm:$0xff] }
 0x5e4   :  { %1831 = vst.msk [vmem:[#allocation2 + $0x50] sm:$0xff] %vm31_vm0, %v1815_v36  ;;  %v1816_v41 = vadd.f32 %v1800_v54, %v1704_v45 }
 0x5e5   :  { %1829 = vst.msk [vmem:[#allocation2 + $0x40] sm:$0xff] %vm31_vm0, %v1813_v40  ;;  %v1814_v62 = vadd.f32 %v1798_v44, %v1702_v38  ;;  %v2855_v39 = vpop.f32.mrb[12].mxu1 }
 0x5e6   :  { %1832 = vst.msk [vmem:[#allocation2 + $0x58] sm:$0xff] %vm31_vm0, %v1816_v41  ;;  %v1687_v35 = vadd.f32 %v2855_v39, %v3680_v46  ;;  %v1678_v33 = vpop.f32.mrb[13].mxu1 }
 0x5e7   :  { %1830 = vst.msk [vmem:[#allocation2 + $0x48] sm:$0xff] %vm31_vm0, %v1814_v62  ;;  %v1679_v48 = vadd.f32 %v3680_v46, %v1678_v33  ;;  %v2856_v47 = vpop.f32.mrb[14].mxu1 }
 0x5e8   :  { %v1803_v2 = vmul.f32 %v1782_v53, %v1687_v35  ;;  %v1690_v57 = vadd.f32 %v2856_v47, %v3680_v46  ;;  %v1681_v31 = vpop.f32.mrb[15].mxu1 }
 0x5e9   :  { %v1801_v60 = vmul.f32 %v1772_v34, %v1679_v48  ;;  %v1682_v56 = vadd.f32 %v3680_v46, %v1681_v31 }
 0x5ea   :  { %v1819_v37 = vadd.f32 %v1803_v2, %v1707_v42  ;;  %v1804_v50 = vmul.f32 %v1787_v59, %v1690_v57 }
 0x5eb   :  { %v1817_v51 = vadd.f32 %v1801_v60, %v1705_v49  ;;  %v1802_v55 = vmul.f32 %v1777_v61, %v1682_v56 }
 0x5ec   :  { %1835 = vst.msk [vmem:[#allocation2 + $0x70] sm:$0xff] %vm31_vm0, %v1819_v37  ;;  %v1820_v63 = vadd.f32 %v1804_v50, %v1708_v52 }
 0x5ed   :  { %1833 = vst.msk [vmem:[#allocation2 + $0x60] sm:$0xff] %vm31_vm0, %v1817_v51  ;;  %v1818_v45 = vadd.f32 %v1802_v55, %v1706_v43 }
 0x5ee   :  { %1836 = vst.msk [vmem:[#allocation2 + $0x78] sm:$0xff] %vm31_vm0, %v1820_v63 }
 0x5ef   :  { %1834 = vst.msk [vmem:[#allocation2 + $0x68] sm:$0xff] %vm31_vm0, %v1818_v45 }
 0x5f0 PF:  { %s2589_s19 = sld [smem:[#allocation4 + $0x3]] }
 0x5f6   :  { %p2590_p8 = scmp.eq.s32.totalorder %s2589_s19, 0 }
 0x5f7   :  { %v3029_v46 = vld [vmem:[%s3917_s3 + $0x30] sm:$0xff] (!%p2590_p8)   ;;  %v2597_v34 = vcombine.low (!%p2590_p8), %v3133_v0, %v3138_v1  ;;  %v3030_v58 = vld [vmem:[%s3917_s3 + $0x38] sm:$0xff] (!%p2590_p8)   ;;  %v2598_v36 = vcombine.low (!%p2590_p8), %v3159_v3, %v3164_v4  ;;  %v2599_v54 = vcombine.low (!%p2590_p8), %v3169_v5, %v3174_v6  ;;  %v2600_v0 = vcombine.low (!%p2590_p8), %v3179_v7, %v3184_v8  ;;  %v3031_v6 = vld [vmem:[%s3919_s5 + $0x60] sm:$0xff] (!%p2590_p8)  }
 0x5f8   :  { %1842 = sbr.rel (%p2590_p8) target bundleno = 2019 (0x7e3), region = 41  ;;  %2857 = vmatprep.subr.bf16.mxu0 (!%p2590_p8), %v3029_v46  ;;  %v2601_v1 = vcombine.low (!%p2590_p8), %v3189_v9, %v3194_v10  ;;  %v2602_v3 = vcombine.low (!%p2590_p8), %v3199_v11, %v3204_v12  ;;  %v2603_v4 = vcombine.low (!%p2590_p8), %v3209_v13, %v3214_v14  ;;  %v2604_v5 = vcombine.low (!%p2590_p8), %v3219_v15, %v3224_v16  ;;  %v3032_v7 = vld [vmem:[%s3919_s5 + $0x68] sm:$0xff] (!%p2590_p8)   ;;  %v3033_v8 = vld [vmem:[%s3919_s5 + $0x70] sm:$0xff] (!%p2590_p8)   ;;  %v3034_v9 = vld [vmem:[%s3919_s5 + $0x78] sm:$0xff] (!%p2590_p8)  }
 0x5f9   :  { %2861 = vmatprep.mubr.msk.bf16.mxu0 (!%p2590_p8), %vm31_vm0, %v2597_v34  ;;  %2858 = vmatpush3.bf16.msra.mxu0 (!%p2590_p8), %v3029_v46  ;;  %v3086_v10 = vmov (!%p2590_p8), 3   ;;  %v3926_v11 = vld [vmem:[#allocation6_spill] sm:$0xff] (!%p2590_p8)  ;;  %vm2158_vm4 = vcmask (!%p2590_p8), 523264  }
 0x5fa   :  { %2859 = vmatprep.subr.bf16.mxu0 (!%p2590_p8), %v3030_v58  ;;  %2877 = vmatprep.subr.bf16.mxu1 (!%p2590_p8), %v3031_v6  ;;  %v3775_v12 = vld [vmem:[%s3918_s4 + $0x3] ss:$0 sm:$0xff] (!%p2590_p8) }
 0x5fb   :  { %2878 = vmatpush3.bf16.msra.mxu1 (!%p2590_p8), %v3031_v6  ;;  %3028 = vset.pattern.permute.xlu1 (!%p2590_p8), %v3086_v10 }
 0x5fc   :  { %2879 = vmatprep.subr.bf16.mxu1 (!%p2590_p8), %v3032_v7  ;;  %3027 = vset.pattern.permute.xlu0 (!%p2590_p8), %v3086_v10 }
 0x5fd   :  { %2860 = vmatpush3.bf16.msra.mxu0 (!%p2590_p8), %v3030_v58  ;;  %2308 = vperm.xlu1 (!%p2590_p8), %3028, %v3239_v19  }
 0x5fe   :  { %2298 = vperm.xlu0 (!%p2590_p8), %3027, %v3229_v17  }
 0x5ff   :  { %2880 = vmatpush3.bf16.msra.mxu1 %v3032_v7 }
 0x600   :  { %2862 = vmatmul.mubr.msk.bf16.vlgmr.msra.gmra.mrb[0].mxu0 %vm31_vm0, %v2598_v36  ;;  %2881 = vmatprep.subr.bf16.mxu1 %v3033_v8 }
 0x601   :  { %2865 = vmatprep.mubr.msk.bf16.mxu0 %vm31_vm0, %v2599_v54  ;;  %2313 = vperm.xlu1 %3028, %v3244_v20  }
 0x602   :  { %2303 = vperm.xlu0 %3027, %v3234_v18  }
 0x603   :  { %2882 = vmatpush3.bf16.msra.mxu1 %v3033_v8 }
 0x604   :  { %2883 = vmatprep.subr.bf16.mxu1 %v3034_v9 }
 0x605   :  { %2323 = vperm.xlu1 %3028, %v3254_v22  }
 0x606   :  { %2318 = vperm.xlu0 %3027, %v3249_v21  }
 0x607   :  { %2884 = vmatpush3.bf16.msra.mxu1 %v3034_v9 }
 0x608   :  { %2866 = vmatmul.mubr.msk.bf16.gmra.mrb[4].mxu0 %vm31_vm0, %v2600_v0 }
 0x609   :  { %2869 = vmatprep.mubr.msk.bf16.mxu0 %vm31_vm0, %v2601_v1  ;;  %2333 = vperm.xlu1 %3028, %v3264_v24  }
 0x60a   :  { %2328 = vperm.xlu0 %3027, %v3259_v23  }
 0x60d   :  { %2343 = vperm.xlu1 %3028, %v3274_v26  }
 0x60e   :  { %2338 = vperm.xlu0 %3027, %v3269_v25  }
 0x610   :  { %2870 = vmatmul.mubr.msk.bf16.gmra.mrb[8].mxu0 %vm31_vm0, %v2602_v3 }
 0x611   :  { %2873 = vmatprep.mubr.msk.bf16.mxu0 %vm31_vm0, %v2603_v4  ;;  %2353 = vperm.xlu1 %3028, %v3284_v28  }
 0x612   :  { %2348 = vperm.xlu0 %3027, %v3279_v27  }
 0x615   :  { %2363 = vperm.xlu1 %3028, %v3294_v30  }
 0x616   :  { %2358 = vperm.xlu0 %3027, %v3289_v29  }
 0x618   :  { %2874 = vmatmul.mubr.msk.bf16.gmra.mrb[12].mxu0 %vm31_vm0, %v2604_v5 }
 0x619   :  { %2373 = vperm.xlu1 %3028, %v3304_v32  }
 0x61a   :  { %2368 = vperm.xlu0 %3027, %v3926_v11  }
 0x6d3   :  { %v2863_v13 = vpop.f32.mrb[0].mxu0 }
 0x6d4   :  { %v1975_v14 = vadd.f32 %v2863_v13, %v3775_v12  ;;  %v1966_v15 = vpop.f32.mrb[1].mxu0 }
 0x6d5   :  { %v1967_v16 = vadd.f32 %v3775_v12, %v1966_v15  ;;  %v2864_v17 = vpop.f32.mrb[2].mxu0 }
 0x6d6   :  { %v2047_v18 = vmul.f32 0.70710677, %v1975_v14  ;;  %v1978_v19 = vadd.f32 %v2864_v17, %v3775_v12  ;;  %v1969_v20 = vpop.f32.mrb[3].mxu0  ;;  %v2031_v2 = vmul.f32 0.5, %v1975_v14 }
 0x6d7   :  { %v2045_v21 = vmul.f32 0.70710677, %v1967_v16  ;;  %v1970_v22 = vadd.f32 %v3775_v12, %v1969_v20  ;;  %v2029_v45 = vmul.f32 0.5, %v1967_v16 }
 0x6d8   :  { %3035 = verf.f32 %v2047_v18  ;;  %v2048_v23 = vmul.f32 0.70710677, %v1978_v19  ;;  %v2032_v49 = vmul.f32 0.5, %v1978_v19 }
 0x6d9   :  { %3037 = verf.f32 %v2045_v21  ;;  %v2046_v24 = vmul.f32 0.70710677, %v1970_v22  ;;  %v2030_v46 = vmul.f32 0.5, %v1970_v22 }
 0x6da   :  { %3039 = verf.f32 %v2048_v23 }
 0x6db   :  { %3041 = verf.f32 %v2046_v24  ;;  %v2867_v25 = vpop.f32.mrb[4].mxu0 }
 0x6dc   :  { %v1991_v26 = vadd.f32 %v2867_v25, %v3775_v12  ;;  %v1982_v27 = vpop.f32.mrb[5].mxu0 }
 0x6dd   :  { %v1983_v28 = vadd.f32 %v3775_v12, %v1982_v27  ;;  %v2868_v29 = vpop.f32.mrb[6].mxu0 }
 0x6de   :  { %v2051_v30 = vmul.f32 0.70710677, %v1991_v26  ;;  %v1994_v32 = vadd.f32 %v2868_v29, %v3775_v12  ;;  %v1985_v38 = vpop.f32.mrb[7].mxu0  ;;  %v2035_v13 = vmul.f32 0.5, %v1991_v26 }
 0x6df   :  { %v2049_v61 = vmul.f32 0.70710677, %v1983_v28  ;;  %v1986_v40 = vadd.f32 %v3775_v12, %v1985_v38  ;;  %v2033_v18 = vmul.f32 0.5, %v1983_v28 }
 0x6e0   :  { %3043 = verf.f32 %v2051_v30  ;;  %v2052_v44 = vmul.f32 0.70710677, %v1994_v32  ;;  %v2036_v14 = vmul.f32 0.5, %v1994_v32 }
 0x6e1   :  { %3045 = verf.f32 %v2049_v61  ;;  %v2050_v41 = vmul.f32 0.70710677, %v1986_v40  ;;  %v2034_v19 = vmul.f32 0.5, %v1986_v40 }
 0x6e2   :  { %v3036_v62 = vpop.eup %3035  ;;  %3047 = verf.f32 %v2052_v44 }
 0x6e3   :  { %v3038_v39 = vpop.eup %3037  ;;  %v2079_v35 = vadd.f32 1.0, %v3036_v62  ;;  %3049 = verf.f32 %v2050_v41  ;;  %v2871_v33 = vpop.f32.mrb[8].mxu0 }
 0x6e4   :  { %v3040_v53 = vpop.eup %3039  ;;  %v3786_v42 = vadd.f32 %v2871_v33, %v3775_v12  ;;  %v1998_v48 = vpop.f32.mrb[9].mxu0  ;;  %v2077_v37 = vadd.f32 1.0, %v3038_v39 }
 0x6e5   :  { %v3042_v47 = vpop.eup %3041  ;;  %v2080_v57 = vadd.f32 1.0, %v3040_v53  ;;  %v3789_v31 = vadd.f32 %v3775_v12, %v1998_v48  ;;  %v2872_v59 = vpop.f32.mrb[10].mxu0  ;;  %v2095_v43 = vmul.f32 %v2079_v35, %v2031_v2 }
 0x6e6   :  { %v2055_v60 = vmul.f32 0.70710677, %v3786_v42  ;;  %v3793_v52 = vadd.f32 %v2872_v59, %v3775_v12  ;;  %v2001_v56 = vpop.f32.mrb[11].mxu0  ;;  %v2078_v50 = vadd.f32 1.0, %v3042_v47  ;;  %v2093_v0 = vmul.f32 %v2077_v37, %v2029_v45 }
 0x6e7   :  { %v2096_v51 = vmul.f32 %v2080_v57, %v2032_v49  ;;  %v2053_v55 = vmul.f32 0.70710677, %v3789_v31  ;;  %v2002_v63 = vadd.f32 %v3775_v12, %v2001_v56  ;;  %v2039_v33 = vmul.f32 0.5, %v3786_v42 }
 0x6e8   :  { %3051 = verf.f32 %v2055_v60  ;;  %v2056_v34 = vmul.f32 0.70710677, %v3793_v52  ;;  %v2094_v1 = vmul.f32 %v2078_v50, %v2030_v46  ;;  %v2040_v53 = vmul.f32 0.5, %v3793_v52 }
 0x6e9   :  { %v2110_v58 = vpack.c.bf16 %v2096_v51, %v2095_v43  ;;  %3053 = verf.f32 %v2053_v55  ;;  %v2054_v36 = vmul.f32 0.70710677, %v2002_v63  ;;  %v2037_v48 = vmul.f32 0.5, %v3789_v31 }
 0x6ea   :  { %v3044_v54 = vpop.eup %3043  ;;  %3055 = verf.f32 %v2056_v34  ;;  %v2109_v10 = vpack.c.bf16 %v2094_v1, %v2093_v0  ;;  %v2038_v47 = vmul.f32 0.5, %v2002_v63 }
 0x6eb   :  { %v3046_v3 = vpop.eup %3045  ;;  %v2083_v4 = vadd.f32 1.0, %v3044_v54  ;;  %3057 = verf.f32 %v2054_v36  ;;  %v2875_v5 = vpop.f32.mrb[12].mxu0 }
 0x6ec   :  { %v3048_v6 = vpop.eup %3047  ;;  %v2081_v7 = vadd.f32 1.0, %v3046_v3  ;;  %v2023_v8 = vadd.f32 %v2875_v5, %v3775_v12  ;;  %v2014_v9 = vpop.f32.mrb[13].mxu0  ;;  %2885 = vmatprep.mubr.msk.bf16.mxu1 %vm2158_vm4, %v2109_v10 }
 0x6ed   :  { %v3050_v11 = vpop.eup %3049  ;;  %v2084_v15 = vadd.f32 1.0, %v3048_v6  ;;  %v2015_v16 = vadd.f32 %v3775_v12, %v2014_v9  ;;  %v2876_v17 = vpop.f32.mrb[14].mxu0  ;;  %v2099_v23 = vmul.f32 %v2083_v4, %v2035_v13  ;;  %2886 = vmatmul.mubr.msk.bf16.vlgmr.msra.gmra.mrb[0].mxu1 %vm2158_vm4, %v2110_v58 }
 0x6ee   :  { %v2082_v20 = vadd.f32 1.0, %v3050_v11  ;;  %v2059_v21 = vmul.f32 0.70710677, %v2023_v8  ;;  %v2017_v22 = vpop.f32.mrb[15].mxu0  ;;  %v2026_v27 = vadd.f32 %v2876_v17, %v3775_v12  ;;  %v2097_v26 = vmul.f32 %v2081_v7, %v2033_v18  ;;  %v2299_v5 = vpop.permute.xlu0 %2298  ;;  %v3816_v11 = vld [vmem:[%s3920_s6 + $0x3] ss:$0 sm:$0xff] }
 0x6ef   :  { %v2100_v24 = vmul.f32 %v2084_v15, %v2036_v14  ;;  %v2057_v25 = vmul.f32 0.70710677, %v2015_v16  ;;  %v2018_v30 = vadd.f32 %v3775_v12, %v2017_v22  ;;  %v2043_v45 = vmul.f32 0.5, %v2023_v8  ;;  %v2309_v6 = vpop.permute.xlu1 %2308  ;;  %v2282_v17 = vld [vmem:[#allocation2 + $0x10] sm:$0xff] }
 0x6f0   :  { %v2098_v29 = vmul.f32 %v2082_v20, %v2034_v19  ;;  %3059 = verf.f32 %v2059_v21  ;;  %v2060_v28 = vmul.f32 0.70710677, %v2026_v27  ;;  %v2044_v31 = vmul.f32 0.5, %v2026_v27  ;;  %v2280_v21 = vld [vmem:[#allocation2] sm:$0xff]  ;;  %v2283_v27 = vld [vmem:[#allocation2 + $0x18] sm:$0xff] }
 0x6f1   :  { %v2112_v32 = vpack.c.bf16 %v2100_v24, %v2099_v23  ;;  %3061 = verf.f32 %v2057_v25  ;;  %v2058_v40 = vmul.f32 0.70710677, %v2018_v30  ;;  %v2041_v46 = vmul.f32 0.5, %v2015_v16 }
 0x6f2   :  { %v3052_v38 = vpop.eup %3051  ;;  %v2111_v61 = vpack.c.bf16 %v2098_v29, %v2097_v26  ;;  %3063 = verf.f32 %v2060_v28  ;;  %v2042_v34 = vmul.f32 0.5, %v2018_v30  ;;  %v2304_v7 = vpop.permute.xlu0 %2303 }
 0x6f3   :  { %v3054_v44 = vpop.eup %3053  ;;  %v2087_v41 = vadd.f32 1.0, %v3052_v38  ;;  %3065 = verf.f32 %v2058_v40  ;;  %v2314_v8 = vpop.permute.xlu1 %2313 }
 0x6f4   :  { %v3056_v62 = vpop.eup %3055  ;;  %v2085_v39 = vadd.f32 1.0, %v3054_v44  ;;  %2889 = vmatprep.mubr.msk.bf16.mxu1 %vm2158_vm4, %v2111_v61 }
 0x6f5   :  { %v3058_v35 = vpop.eup %3057  ;;  %v2088_v12 = vadd.f32 1.0, %v3056_v62  ;;  %v2103_v49 = vmul.f32 %v2087_v41, %v2039_v33  ;;  %2890 = vmatmul.mubr.msk.bf16.gmra.mrb[4].mxu1 %vm2158_vm4, %v2112_v32  ;;  %v2281_v32 = vld [vmem:[#allocation2 + $0x8] sm:$0xff]  ;;  %v2286_v33 = vld [vmem:[#allocation2 + $0x30] sm:$0xff] }
 0x6f6   :  { %v2086_v2 = vadd.f32 1.0, %v3058_v35  ;;  %v2101_v59 = vmul.f32 %v2085_v39, %v2037_v48  ;;  %v2319_v9 = vpop.permute.xlu0 %2318 }
 0x6f7   :  { %v2104_v57 = vmul.f32 %v2088_v12, %v2040_v53  ;;  %v2324_v10 = vpop.permute.xlu1 %2323 }
 0x6f8   :  { %v2102_v60 = vmul.f32 %v2086_v2, %v2038_v47  ;;  %v2284_v47 = vld [vmem:[#allocation2 + $0x20] sm:$0xff] }
 0x6f9   :  { %v2114_v56 = vpack.c.bf16 %v2104_v57, %v2103_v49 }
 0x6fa   :  { %v3060_v37 = vpop.eup %3059  ;;  %v2113_v50 = vpack.c.bf16 %v2102_v60, %v2101_v59  ;;  %v2329_v16 = vpop.permute.xlu0 %2328  ;;  %v2287_v59 = vld [vmem:[#allocation2 + $0x38] sm:$0xff] }
 0x6fb   :  { %v3062_v43 = vpop.eup %3061  ;;  %v2091_v51 = vadd.f32 1.0, %v3060_v37  ;;  %v2334_v24 = vpop.permute.xlu1 %2333 }
 0x6fc   :  { %2893 = vmatprep.mubr.msk.bf16.mxu1 %vm2158_vm4, %v2113_v50  ;;  %v3064_v42 = vpop.eup %3063  ;;  %v2089_v52 = vadd.f32 1.0, %v3062_v43  ;;  %v2285_v50 = vld [vmem:[#allocation2 + $0x28] sm:$0xff] }
 0x6fd   :  { %v3066_v55 = vpop.eup %3065  ;;  %v2092_v63 = vadd.f32 1.0, %v3064_v42  ;;  %2894 = vmatmul.mubr.msk.bf16.gmra.mrb[8].mxu1 %vm2158_vm4, %v2114_v56  ;;  %v2107_v36 = vmul.f32 %v2091_v51, %v2043_v45 }
 0x6fe   :  { %v2090_v58 = vadd.f32 1.0, %v3066_v55  ;;  %v2105_v0 = vmul.f32 %v2089_v52, %v2041_v46  ;;  %v2339_v40 = vpop.permute.xlu0 %2338 }
 0x6ff   :  { %v2108_v54 = vmul.f32 %v2092_v63, %v2044_v31  ;;  %v2344_v35 = vpop.permute.xlu1 %2343 }
 0x700   :  { %v2106_v1 = vmul.f32 %v2090_v58, %v2042_v34  ;;  %v2290_v34 = vld [vmem:[#allocation2 + $0x50] sm:$0xff] }
 0x701   :  { %v2116_v3 = vpack.c.bf16 %v2108_v54, %v2107_v36 }
 0x702   :  { %v2115_v4 = vpack.c.bf16 %v2106_v1, %v2105_v0  ;;  %v2349_v43 = vpop.permute.xlu0 %2348  ;;  %v2288_v0 = vld [vmem:[#allocation2 + $0x40] sm:$0xff] }
 0x703   :  { %v2354_v55 = vpop.permute.xlu1 %2353 }
 0x704   :  { %2897 = vmatprep.mubr.msk.bf16.mxu1 %vm2158_vm4, %v2115_v4 }
 0x705   :  { %2898 = vmatmul.mubr.msk.bf16.gmra.mrb[12].mxu1 %vm2158_vm4, %v2116_v3 }
 0x706   :  { %v2359_v4 = vpop.permute.xlu0 %2358 }
 0x7c0   :  { %v2887_v13 = vpop.f32.mrb[0].mxu1 }
 0x7c1   :  { %v2226_v14 = vadd.f32 %v2887_v13, %v3816_v11  ;;  %v2217_v15 = vpop.f32.mrb[1].mxu1  ;;  %v2364_v13 = vpop.permute.xlu1 %2363 }
 0x7c2   :  { %v2218_v18 = vadd.f32 %v3816_v11, %v2217_v15  ;;  %v2888_v19 = vpop.f32.mrb[2].mxu1 }
 0x7c3   :  { %v2378_v20 = vmul.f32 %v2309_v6, %v2226_v14  ;;  %v2229_v22 = vadd.f32 %v2888_v19, %v3816_v11  ;;  %v2220_v23 = vpop.f32.mrb[3].mxu1  ;;  %v2291_v6 = vld [vmem:[#allocation2 + $0x58] sm:$0xff] }
 0x7c4   :  { %v2376_v25 = vmul.f32 %v2299_v5, %v2218_v18  ;;  %v2221_v26 = vadd.f32 %v3816_v11, %v2220_v23 }
 0x7c5   :  { %v2394_v29 = vadd.f32 %v2378_v20, %v2282_v17  ;;  %v2379_v30 = vmul.f32 %v2314_v8, %v2229_v22  ;;  %v2294_v22 = vld [vmem:[#allocation2 + $0x70] sm:$0xff] }
 0x7c6   :  { %v2392_v28 = vadd.f32 %v2376_v25, %v2280_v21  ;;  %v2377_v38 = vmul.f32 %v2304_v7, %v2221_v26  ;;  %v2369_v21 = vpop.permute.xlu0 %2368 }
 0x7c7   :  { %2410 = vst.msk [vmem:[#allocation2 + $0x10] sm:$0xff] %vm31_vm0, %v2394_v29  ;;  %v2395_v61 = vadd.f32 %v2379_v30, %v2283_v27  ;;  %v2292_v27 = vld [vmem:[#allocation2 + $0x60] sm:$0xff]  ;;  %v2374_v30 = vpop.permute.xlu1 %2373 }
 0x7c8   :  { %2408 = vst.msk [vmem:[#allocation2] sm:$0xff] %vm31_vm0, %v2392_v28  ;;  %v2393_v44 = vadd.f32 %v2377_v38, %v2281_v32  ;;  %v2891_v41 = vpop.f32.mrb[4].mxu1  ;;  %v2295_v28 = vld [vmem:[#allocation2 + $0x78] sm:$0xff] }
 0x7c9   :  { %2411 = vst.msk [vmem:[#allocation2 + $0x18] sm:$0xff] %vm31_vm0, %v2395_v61  ;;  %v2242_v62 = vadd.f32 %v2891_v41, %v3816_v11  ;;  %v2233_v39 = vpop.f32.mrb[5].mxu1 }
 0x7ca   :  { %2409 = vst.msk [vmem:[#allocation2 + $0x8] sm:$0xff] %vm31_vm0, %v2393_v44  ;;  %v2234_v53 = vadd.f32 %v3816_v11, %v2233_v39  ;;  %v2892_v12 = vpop.f32.mrb[6].mxu1  ;;  %v2293_v44 = vld [vmem:[#allocation2 + $0x68] sm:$0xff] }
 0x7cb   :  { %v2382_v48 = vmul.f32 %v2329_v16, %v2242_v62  ;;  %v2245_v2 = vadd.f32 %v2892_v12, %v3816_v11  ;;  %v2236_v49 = vpop.f32.mrb[7].mxu1 }
 0x7cc   :  { %v2380_v57 = vmul.f32 %v2319_v9, %v2234_v53  ;;  %v2237_v60 = vadd.f32 %v3816_v11, %v2236_v49 }
 0x7cd   :  { %v2398_v56 = vadd.f32 %v2382_v48, %v2286_v33  ;;  %v2383_v37 = vmul.f32 %v2334_v24, %v2245_v2 }
 0x7ce   :  { %v2396_v51 = vadd.f32 %v2380_v57, %v2284_v47  ;;  %v2381_v42 = vmul.f32 %v2324_v10, %v2237_v60  ;;  %v2289_v10 = vld [vmem:[#allocation2 + $0x48] sm:$0xff] }
 0x7cf   :  { %2414 = vst.msk [vmem:[#allocation2 + $0x30] sm:$0xff] %vm31_vm0, %v2398_v56  ;;  %v2399_v52 = vadd.f32 %v2383_v37, %v2287_v59 }
 0x7d0   :  { %2412 = vst.msk [vmem:[#allocation2 + $0x20] sm:$0xff] %vm31_vm0, %v2396_v51  ;;  %v2397_v45 = vadd.f32 %v2381_v42, %v2285_v50  ;;  %v2895_v31 = vpop.f32.mrb[8].mxu1 }
 0x7d1   :  { %2415 = vst.msk [vmem:[#allocation2 + $0x38] sm:$0xff] %vm31_vm0, %v2399_v52  ;;  %v2258_v63 = vadd.f32 %v2895_v31, %v3816_v11  ;;  %v2249_v46 = vpop.f32.mrb[9].mxu1 }
 0x7d2   :  { %2413 = vst.msk [vmem:[#allocation2 + $0x28] sm:$0xff] %vm31_vm0, %v2397_v45  ;;  %v2250_v58 = vadd.f32 %v3816_v11, %v2249_v46  ;;  %v2896_v36 = vpop.f32.mrb[10].mxu1 }
 0x7d3   :  { %v2386_v54 = vmul.f32 %v2349_v43, %v2258_v63  ;;  %v2261_v1 = vadd.f32 %v2896_v36, %v3816_v11  ;;  %v2252_v3 = vpop.f32.mrb[11].mxu1 }
 0x7d4   :  { %v2384_v5 = vmul.f32 %v2339_v40, %v2250_v58  ;;  %v2253_v7 = vadd.f32 %v3816_v11, %v2252_v3 }
 0x7d5   :  { %v2402_v8 = vadd.f32 %v2386_v54, %v2290_v34  ;;  %v2387_v9 = vmul.f32 %v2354_v55, %v2261_v1 }
 0x7d6   :  { %v2400_v14 = vadd.f32 %v2384_v5, %v2288_v0  ;;  %v2385_v15 = vmul.f32 %v2344_v35, %v2253_v7 }
 0x7d7   :  { %2418 = vst.msk [vmem:[#allocation2 + $0x50] sm:$0xff] %vm31_vm0, %v2402_v8  ;;  %v2403_v16 = vadd.f32 %v2387_v9, %v2291_v6 }
 0x7d8   :  { %2416 = vst.msk [vmem:[#allocation2 + $0x40] sm:$0xff] %vm31_vm0, %v2400_v14  ;;  %v2401_v17 = vadd.f32 %v2385_v15, %v2289_v10  ;;  %v2899_v18 = vpop.f32.mrb[12].mxu1 }
 0x7d9   :  { %2419 = vst.msk [vmem:[#allocation2 + $0x58] sm:$0xff] %vm31_vm0, %v2403_v16  ;;  %v2274_v19 = vadd.f32 %v2899_v18, %v3816_v11  ;;  %v2265_v20 = vpop.f32.mrb[13].mxu1 }
 0x7da   :  { %2417 = vst.msk [vmem:[#allocation2 + $0x48] sm:$0xff] %vm31_vm0, %v2401_v17  ;;  %v2266_v23 = vadd.f32 %v3816_v11, %v2265_v20  ;;  %v2900_v24 = vpop.f32.mrb[14].mxu1 }
 0x7db   :  { %v2390_v25 = vmul.f32 %v2369_v21, %v2274_v19  ;;  %v2277_v26 = vadd.f32 %v2900_v24, %v3816_v11  ;;  %v2268_v29 = vpop.f32.mrb[15].mxu1 }
 0x7dc   :  { %v2388_v32 = vmul.f32 %v2359_v4, %v2266_v23  ;;  %v2269_v38 = vadd.f32 %v3816_v11, %v2268_v29 }
 0x7dd   :  { %v2406_v61 = vadd.f32 %v2390_v25, %v2294_v22  ;;  %v2391_v40 = vmul.f32 %v2374_v30, %v2277_v26 }
 0x7de   :  { %v2404_v41 = vadd.f32 %v2388_v32, %v2292_v27  ;;  %v2389_v62 = vmul.f32 %v2364_v13, %v2269_v38 }
 0x7df   :  { %2422 = vst.msk [vmem:[#allocation2 + $0x70] sm:$0xff] %vm31_vm0, %v2406_v61  ;;  %v2407_v39 = vadd.f32 %v2391_v40, %v2295_v28 }
 0x7e0   :  { %2420 = vst.msk [vmem:[#allocation2 + $0x60] sm:$0xff] %vm31_vm0, %v2404_v41  ;;  %v2405_v35 = vadd.f32 %v2389_v62, %v2293_v44 }
 0x7e1   :  { %2423 = vst.msk [vmem:[#allocation2 + $0x78] sm:$0xff] %vm31_vm0, %v2407_v39 }
 0x7e2   :  { %2421 = vst.msk [vmem:[#allocation2 + $0x68] sm:$0xff] %vm31_vm0, %v2405_v35 }
 0x7e3 PF:  { %v2424_v33 = vld [vmem:[#allocation2] sm:$0xff]  ;;  %v2425_v53 = vld [vmem:[#allocation2 + $0x8] sm:$0xff]  ;;  %v2426_v12 = vld [vmem:[#allocation2 + $0x10] sm:$0xff] }
 0x7e4   :  { %2440 = vst.msk [vmem:[%s3921_s7] sm:$0xff] %vm31_vm0, %v2424_v33  ;;  %2441 = vst.msk [vmem:[%s3921_s7 + $0x8] sm:$0xff] %vm31_vm0, %v2425_v53  ;;  %v2427_v11 = vld [vmem:[#allocation2 + $0x18] sm:$0xff]  ;;  %v2428_v48 = vld [vmem:[#allocation2 + $0x20] sm:$0xff] }
 0x7e5   :  { %2442 = vst.msk [vmem:[%s3921_s7 + $0x10] sm:$0xff] %vm31_vm0, %v2426_v12  ;;  %v2429_v47 = vld [vmem:[#allocation2 + $0x28] sm:$0xff]  ;;  %2443 = vst.msk [vmem:[%s3921_s7 + $0x18] sm:$0xff] %vm31_vm0, %v2427_v11  ;;  %v2430_v2 = vld [vmem:[#allocation2 + $0x30] sm:$0xff] }
 0x7e6   :  { %2444 = vst.msk [vmem:[%s3921_s7 + $0x20] sm:$0xff] %vm31_vm0, %v2428_v48  ;;  %2445 = vst.msk [vmem:[%s3921_s7 + $0x28] sm:$0xff] %vm31_vm0, %v2429_v47  ;;  %v2431_v49 = vld [vmem:[#allocation2 + $0x38] sm:$0xff]  ;;  %v2432_v57 = vld [vmem:[#allocation2 + $0x40] sm:$0xff] }
 0x7e7   :  { %2446 = vst.msk [vmem:[%s3921_s7 + $0x30] sm:$0xff] %vm31_vm0, %v2430_v2  ;;  %2447 = vst.msk [vmem:[%s3921_s7 + $0x38] sm:$0xff] %vm31_vm0, %v2431_v49  ;;  %v2433_v59 = vld [vmem:[#allocation2 + $0x48] sm:$0xff]  ;;  %v2434_v60 = vld [vmem:[#allocation2 + $0x50] sm:$0xff] }
 0x7e8   :  { %2448 = vst.msk [vmem:[%s3921_s7 + $0x40] sm:$0xff] %vm31_vm0, %v2432_v57  ;;  %v2435_v56 = vld [vmem:[#allocation2 + $0x58] sm:$0xff]  ;;  %2449 = vst.msk [vmem:[%s3921_s7 + $0x48] sm:$0xff] %vm31_vm0, %v2433_v59  ;;  %v2436_v37 = vld [vmem:[#allocation2 + $0x60] sm:$0xff] }
 0x7e9   :  { %2450 = vst.msk [vmem:[%s3921_s7 + $0x50] sm:$0xff] %vm31_vm0, %v2434_v60  ;;  %2451 = vst.msk [vmem:[%s3921_s7 + $0x58] sm:$0xff] %vm31_vm0, %v2435_v56  ;;  %v2437_v50 = vld [vmem:[#allocation2 + $0x68] sm:$0xff]  ;;  %v2438_v43 = vld [vmem:[#allocation2 + $0x70] sm:$0xff] }
 0x7ea   :  { %2452 = vst.msk [vmem:[%s3921_s7 + $0x60] sm:$0xff] %vm31_vm0, %v2436_v37  ;;  %2453 = vst.msk [vmem:[%s3921_s7 + $0x68] sm:$0xff] %vm31_vm0, %v2437_v50  ;;  %v2439_v51 = vld [vmem:[#allocation2 + $0x78] sm:$0xff] }
 0x7eb   :  { %2454 = vst.msk [vmem:[%s3921_s7 + $0x70] sm:$0xff] %vm31_vm0, %v2438_v43  ;;  %2455 = vst.msk [vmem:[%s3921_s7 + $0x78] sm:$0xff] %vm31_vm0, %v2439_v51 }

</bundles_post_ra>
